<compile_context>
chip_gen: v6e
topology: v6e:2x2x1
jax: 0.10.0
libtpu: 0.0.40
codegen_flags: <defaults>
</compile_context>

<pallas_src>
import jax
import jax.numpy as jnp
from jax.experimental import pallas as pl
from jax.experimental.pallas import tpu as pltpu


def _round_up(x, m):
    return (x + m - 1) // m * m


def _device_kind():
    try:
        return jax.devices()[0].device_kind.lower()
    except Exception:
        return ""


def _vmem_capacity_bytes():
    try:
        return int(pltpu.get_tpu_info().vmem_capacity_bytes)
    except Exception:
        kind = _device_kind()
        if "v7" in kind:
            return 64 * 1024 * 1024
        return 128 * 1024 * 1024


def _bernstein_k3_kernel(coef_ref, L_ref, x_ref, out_ref):
    """One F-tile of out = c0*Tx0 + c1*Tx1 + c2*Tx2 + c3*Tx3, Tx_{k+1} = L @ Tx_k.

    coef_ref : SMEM (4,) f32      -- collapsed Bernstein coefficients (scalar prefetch)
    L_ref    : VMEM (N, N)        -- resident Laplacian (constant index_map, 1-buffered)
    x_ref    : VMEM (N, tF)       -- matmul dtype (f32 or bf16)
    out_ref  : VMEM (N, tF) f32
    """
    L = L_ref[...]
    tx_in = x_ref[...]                                                    # Tx0 (mm dtype)
    poly = coef_ref[0] * tx_in.astype(jnp.float32)
    tx = jnp.dot(L, tx_in, preferred_element_type=jnp.float32)            # Tx1
    poly += coef_ref[1] * tx
    tx = jnp.dot(L, tx.astype(L.dtype), preferred_element_type=jnp.float32)  # Tx2
    poly += coef_ref[2] * tx
    tx = jnp.dot(L, tx.astype(L.dtype), preferred_element_type=jnp.float32)  # Tx3
    poly += coef_ref[3] * tx
    out_ref[...] = poly.astype(out_ref.dtype)


def _matmul_kernel(a_ref, b_ref, o_ref, acc_ref):
    """Standard tiled matmul (streamed-L fallback): o = a @ b, f32 accumulation."""
    @pl.when(pl.program_id(2) == 0)
    def _init():
        acc_ref[...] = jnp.zeros_like(acc_ref)

    acc_ref[...] += jnp.dot(a_ref[...], b_ref[...],
                            preferred_element_type=jnp.float32)

    @pl.when(pl.program_id(2) == pl.num_programs(2) - 1)
    def _fin():
        o_ref[...] = acc_ref[...].astype(o_ref.dtype)


def _streamed_matmul(a, b, *, tm, tn, tk, vmem_limit):
    M, K = a.shape
    _, N = b.shape
    grid = (M // tm, N // tn, K // tk)
    return pl.pallas_call(
        _matmul_kernel,
        out_shape=jax.ShapeDtypeStruct((M, N), jnp.float32),
        grid_spec=pltpu.PrefetchScalarGridSpec(
            num_scalar_prefetch=0,
            grid=grid,
            in_specs=[pl.BlockSpec((tm, tk), lambda i, j, k: (i, k)),
                      pl.BlockSpec((tk, tn), lambda i, j, k: (k, j))],
            out_specs=pl.BlockSpec((tm, tn), lambda i, j, k: (i, j)),
            scratch_shapes=[pltpu.VMEM((tm, tn), jnp.float32)]),
        compiler_params=pltpu.CompilerParams(
            dimension_semantics=("parallel", "parallel", "arbitrary"),
            vmem_limit_bytes=vmem_limit),
    )(a, b)


class BernsteinLayerPallas:
    """JAX/Pallas port of BernsteinLayer with K == 3."""

    def __init__(self, theta_list, K=3, out_channels=None, softmax_theta=True,
                 matmul_dtype=jnp.bfloat16, force_stream_L=False):
        assert len(theta_list) == K + 1
        assert K == 3, "This Pallas port implements K == 3"
        # TODO(synk): K == 4 branch (extra L@Tx3 matmul + 5-term basis) not ported.
        self.K = K
        self.softmax_theta = softmax_theta
        self.matmul_dtype = jnp.dtype(matmul_dtype)   # bf16 (fast MXU) or f32 (exact)
        self.force_stream_L = force_stream_L
        self.thetas = jnp.asarray(theta_list, dtype=jnp.float32)  # (4,)

    def coefficients(self):
        """Collapse the Bernstein basis into coefficients of Tx0..Tx3."""
        t = jax.nn.softmax(self.thetas) if self.softmax_theta else self.thetas
        c0 = t[0]
        c1 = 3.0 * (t[1] - t[0])
        c2 = 3.0 * (t[0] - 2.0 * t[1] + t[2])
        c3 = -t[0] + 3.0 * t[1] - 3.0 * t[2] + t[3]
        return jnp.stack([c0, c1, c2, c3]).astype(jnp.float32)

    # ------------------------------------------------------------------ #

    def __call__(self, x, L):
        N, F = x.shape
        assert L.shape == (N, N)
        coefs = self.coefficients()
        mm_dtype = self.matmul_dtype
        mm_isz = mm_dtype.itemsize

        kind = _device_kind()
        is_v5 = "v5" in kind
        is_v7 = "v7" in kind

        vmem_cap = _vmem_capacity_bytes()
        usable = max(vmem_cap - 16 * 1024 * 1024, vmem_cap // 2)

        # Lane/sublane-dense padding: 256-wide F alignment for the 256-wide MXU on
        # v6e/v7x (128 on v5e); 16-row alignment for bf16's (16,128) tile.
        lane_align = 128 if is_v5 else 256
        sub_align = 16 if mm_isz == 2 else 8
        n_pad = _round_up(N, sub_align)
        f_pad = _round_up(max(F, 128), lane_align)

        l_bytes = n_pad * n_pad * mm_isz              # single-buffered resident L

        # Widest F tile whose full working set fits ~75% of usable VMEM.
        tF = None
        for cand in (1024, 512, 256, 128):
            if f_pad % cand != 0:
                continue
            tiles = (2 * n_pad * cand * mm_isz        # x tiles (double-buffered)
                     + 2 * n_pad * cand * 4           # out tiles (double-buffered)
                     + 3 * n_pad * cand * 4)          # live f32 slabs (poly, tx, cast)
            if l_bytes + tiles <= int(0.75 * usable):
                tF = cand
                break

        if self.force_stream_L or tF is None:
            # Resident L does not fit -> stream L from HBM instead.
            return self._streamed(x, L, coefs, usable)[:N, :F]

        # Megacore: make sure the parallel F axis has >= 2 tiles on v7x (2 TCs),
        # without adding padding work.
        if is_v7:
            while f_pad // tF < 2 and tF > 128:
                tF //= 2

        x_p = x.astype(mm_dtype)
        if (n_pad, f_pad) != (N, F):
            x_p = jnp.pad(x_p, ((0, n_pad - N), (0, f_pad - F)))
        L_p = L.astype(mm_dtype)
        if n_pad != N:
            L_p = jnp.pad(L_p, ((0, n_pad - N), (0, n_pad - N)))

        tile_bytes = (2 * n_pad * tF * mm_isz + 2 * n_pad * tF * 4
                      + 3 * n_pad * tF * 4)
        vmem_need = l_bytes + tile_bytes
        vmem_limit = int(min(max(vmem_need * 5 // 4, 8 * 1024 * 1024), usable))

        cost = pl.CostEstimate(
            flops=2 * 3 * n_pad * n_pad * f_pad,
            transcendentals=0,
            bytes_accessed=l_bytes + n_pad * f_pad * (mm_isz + 4) + 16,
        )

        def build_call(single_buffer_L):
            l_kwargs = dict(pipeline_mode=pl.Buffered(1)) if single_buffer_L else {}
            grid_spec = pltpu.PrefetchScalarGridSpec(
                num_scalar_prefetch=1,
                grid=(f_pad // tF,),
                in_specs=[
                    # L: constant index_map -> resident in VMEM across all F tiles.
                    pl.BlockSpec((n_pad, n_pad), lambda j, coef: (0, 0), **l_kwargs),
                    # x: one (N, tF) tile per grid step (software pipelined).
                    pl.BlockSpec((n_pad, tF), lambda j, coef: (0, j)),
                ],
                out_specs=pl.BlockSpec((n_pad, tF), lambda j, coef: (0, j)),
            )
            return pl.pallas_call(
                _bernstein_k3_kernel,
                out_shape=jax.ShapeDtypeStruct((n_pad, f_pad), jnp.float32),
                grid_spec=grid_spec,
                compiler_params=pltpu.CompilerParams(
                    dimension_semantics=("parallel",),
                    vmem_limit_bytes=vmem_limit,
                ),
                cost_estimate=cost,
            )

        try:
            out = build_call(True)(coefs, L_p, x_p)
        except Exception:
            # pl.Buffered(1) rejected by this jax version -> default double-buffering.
            out = build_call(False)(coefs, L_p, x_p)

        return out[:N, :F]

    # ------------------------------------------------------------------ #

    def _streamed(self, x, L, coefs, usable):
        """Large-N fallback: L streamed from HBM through a tiled matmul per stage."""
        # TODO(synk): fuse the coefficient accumulation into the last matmul stage.
        N, F = x.shape
        mm_dtype = self.matmul_dtype
        mm_isz = mm_dtype.itemsize

        tm = tk = 256
        n_pad = _round_up(N, 256)
        f_pad = _round_up(max(F, 128), 128)
        tn = 256 if f_pad % 256 == 0 else 128

        x_p = x.astype(jnp.float32)
        if (n_pad, f_pad) != (N, F):
            x_p = jnp.pad(x_p, ((0, n_pad - N), (0, f_pad - F)))
        L_p = L.astype(mm_dtype)
        if n_pad != N:
            L_p = jnp.pad(L_p, ((0, n_pad - N), (0, n_pad - N)))

        vmem_need = (2 * tm * tk * mm_isz + 2 * tk * tn * mm_isz
                     + 2 * tm * tn * 4 + tm * tn * 4)
        vmem_limit = int(min(max(vmem_need * 2, 8 * 1024 * 1024), usable))

        def spmm(rhs):
            return _streamed_matmul(L_p, rhs.astype(mm_dtype),
                                    tm=tm, tn=tn, tk=tk, vmem_limit=vmem_limit)

        tx1 = spmm(x_p)
        tx2 = spmm(tx1)
        tx3 = spmm(tx2)
        return coefs[0] * x_p + coefs[1] * tx1 + coefs[2] * tx2 + coefs[3] * tx3


# ---------------------------------------------------------------------- #

def _reference(x, L, thetas, softmax_theta=True):
    """Pure-JAX reference mirroring the PyTorch forward (K == 3)."""
    Tx0 = x
    Tx1 = L @ x
    Tx2 = L @ Tx1
    Tx3 = L @ Tx2
    Bx03 = Tx0 - 3 * Tx1 + 3 * Tx2 - Tx3
    Bx13 = 3 * Tx1 - 6 * Tx2 + 3 * Tx3
    Bx23 = 3 * Tx2 - 3 * Tx3
    Bx33 = Tx3
    t = jax.nn.softmax(thetas) if softmax_theta else thetas
    return t[0] * Bx03 + t[1] * Bx13 + t[2] * Bx23 + t[3] * Bx33


if __name__ == "__main__":
    key = jax.random.PRNGKey(0)
    k_x, k_L = jax.random.split(key)

    N, F = 128, 64  # nodes, feature channels (F=64 exercises the lane padding path)
    x = jax.random.normal(k_x, (N, F), dtype=jnp.float32)

    # Deterministic symmetric, normalized-Laplacian-like dense L.
    A = jax.random.uniform(k_L, (N, N), dtype=jnp.float32)
    A = (A + A.T) * 0.5
    A = (A > 0.9).astype(jnp.float32)
    A = A * (1.0 - jnp.eye(N, dtype=jnp.float32))
    deg = jnp.maximum(A.sum(axis=1), 1.0)
    d_inv_sqrt = 1.0 / jnp.sqrt(deg)
    L = jnp.eye(N, dtype=jnp.float32) - d_inv_sqrt[:, None] * A * d_inv_sqrt[None, :]

    theta_list = [0.1, 0.2, 0.3, 0.4]
    ref = _reference(x, L, jnp.asarray(theta_list, jnp.float32), softmax_theta=True)

    # Exact (f32 MXU operands) resident-L path: must match the reference tightly.
    layer_f32 = BernsteinLayerPallas(theta_list, K=3, out_channels=F,
                                     softmax_theta=True, matmul_dtype=jnp.float32)
    out_f32 = jax.block_until_ready(layer_f32(x, L))
    assert out_f32.shape == (N, F)
    assert jnp.allclose(out_f32, ref, atol=1e-4, rtol=1e-4), (
        f"f32 max abs err = {jnp.max(jnp.abs(out_f32 - ref))}")

    # Default fast path (bf16 MXU operands, f32 accumulation): looser tolerance.
    layer_bf16 = BernsteinLayerPallas(theta_list, K=3, out_channels=F,
                                      softmax_theta=True)
    out_bf16 = jax.block_until_ready(layer_bf16(x, L))
    assert out_bf16.shape == (N, F)
    assert jnp.allclose(out_bf16, ref, atol=0.2, rtol=0.1), (
        f"bf16 max abs err = {jnp.max(jnp.abs(out_bf16 - ref))}")

    # Streamed-L fallback path (large-N code path), exercised at small N with f32.
    layer_stream = BernsteinLayerPallas(theta_list, K=3, out_channels=F,
                                        softmax_theta=True,
                                        matmul_dtype=jnp.float32,
                                        force_stream_L=True)
    out_stream = jax.block_until_ready(layer_stream(x, L))
    assert out_stream.shape == (N, F)
    assert jnp.allclose(out_stream, ref, atol=1e-4, rtol=1e-4), (
        f"stream max abs err = {jnp.max(jnp.abs(out_stream - ref))}")

    print("KERNEL_OK")
</pallas_src>

<mosaic_0001>
module attributes {stable_mosaic.version = 11 : i64} {
  func.func @_bernstein_k3_kernel(%arg0: i32, %arg1: memref<4xf32, #tpu.memory_space<smem>>, %arg2: memref<128x128xf32, #tpu.memory_space<vmem>>, %arg3: memref<128x256xf32, #tpu.memory_space<vmem>>, %arg4: memref<128x256xf32, #tpu.memory_space<vmem>>) attributes {dimension_semantics = [#tpu.dimension_semantics<parallel>], iteration_bounds = array<i64: 1>, scalar_prefetch = 1 : i64, scratch_operands = 0 : i64, tpu.core_type = #tpu.core_type<tc>, window_params = [{pipeline_mode = #tpu.pipeline_mode<synchronous>, transform_indices = @transform_0, window_bounds = array<i64: 128, 128>}, {transform_indices = @transform_1, window_bounds = array<i64: 128, 256>}, {transform_indices = @transform_2, window_bounds = array<i64: 128, 256>}]} {
    %c0 = arith.constant 0 : index
    %c0_0 = arith.constant 0 : index
    %0 = vector.load %arg2[%c0, %c0_0] : memref<128x128xf32, #tpu.memory_space<vmem>>, vector<128x128xf32>
    %c0_1 = arith.constant 0 : index
    %c0_2 = arith.constant 0 : index
    %1 = vector.load %arg3[%c0_1, %c0_2] : memref<128x256xf32, #tpu.memory_space<vmem>>, vector<128x256xf32>
    %c0_3 = arith.constant 0 : index
    %2 = memref.load %arg1[%c0_3] : memref<4xf32, #tpu.memory_space<smem>>
    %3 = vector.broadcast %2 : f32 to vector<128x256xf32>
    %4 = arith.mulf %3, %1 : vector<128x256xf32>
    %cst = arith.constant dense<0.000000e+00> : vector<128x256xf32>
    %5 = tpu.matmul %0, %1, %cst {dimension_numbers = #tpu.dot_dimension_numbers<[1], [0], [0], [1], [0, 0, 1, 1], [], []>} : vector<128x128xf32>, vector<128x256xf32>, vector<128x256xf32> -> vector<128x256xf32>
    %c1 = arith.constant 1 : index
    %6 = memref.load %arg1[%c1] : memref<4xf32, #tpu.memory_space<smem>>
    %7 = vector.broadcast %6 : f32 to vector<128x256xf32>
    %8 = arith.mulf %7, %5 : vector<128x256xf32>
    %9 = arith.addf %4, %8 : vector<128x256xf32>
    %cst_4 = arith.constant dense<0.000000e+00> : vector<128x256xf32>
    %10 = tpu.matmul %0, %5, %cst_4 {dimension_numbers = #tpu.dot_dimension_numbers<[1], [0], [0], [1], [0, 0, 1, 1], [], []>} : vector<128x128xf32>, vector<128x256xf32>, vector<128x256xf32> -> vector<128x256xf32>
    %c2 = arith.constant 2 : index
    %11 = memref.load %arg1[%c2] : memref<4xf32, #tpu.memory_space<smem>>
    %12 = vector.broadcast %11 : f32 to vector<128x256xf32>
    %13 = arith.mulf %12, %10 : vector<128x256xf32>
    %14 = arith.addf %9, %13 : vector<128x256xf32>
    %cst_5 = arith.constant dense<0.000000e+00> : vector<128x256xf32>
    %15 = tpu.matmul %0, %10, %cst_5 {dimension_numbers = #tpu.dot_dimension_numbers<[1], [0], [0], [1], [0, 0, 1, 1], [], []>} : vector<128x128xf32>, vector<128x256xf32>, vector<128x256xf32> -> vector<128x256xf32>
    %c3 = arith.constant 3 : index
    %16 = memref.load %arg1[%c3] : memref<4xf32, #tpu.memory_space<smem>>
    %17 = vector.broadcast %16 : f32 to vector<128x256xf32>
    %18 = arith.mulf %17, %15 : vector<128x256xf32>
    %19 = arith.addf %14, %18 : vector<128x256xf32>
    %c0_6 = arith.constant 0 : index
    %c0_7 = arith.constant 0 : index
    %20 = vector.load %arg4[%c0_6, %c0_7] : memref<128x256xf32, #tpu.memory_space<vmem>>, vector<128x256xf32>
    tpu.vector_store %arg4[%c0_6, %c0_7], %19 {strides = array<i32>} : memref<128x256xf32, #tpu.memory_space<vmem>>, vector<128x256xf32>,
    return
  }
  func.func @transform_0(%arg0: i32, %arg1: memref<4xf32, #tpu.memory_space<smem>>) -> (i32, i32) {
    %c0_i32 = arith.constant 0 : i32
    %c0_i32_0 = arith.constant 0 : i32
    %c0_i32_1 = arith.constant 0 : i32
    return %c0_i32, %c0_i32_0 : i32, i32
  }
  func.func @transform_1(%arg0: i32, %arg1: memref<4xf32, #tpu.memory_space<smem>>) -> (i32, i32) {
    %c0_i32 = arith.constant 0 : i32
    %c0_i32_0 = arith.constant 0 : i32
    return %c0_i32, %arg0 : i32, i32
  }
  func.func @transform_2(%arg0: i32, %arg1: memref<4xf32, #tpu.memory_space<smem>>) -> (i32, i32) {
    %c0_i32 = arith.constant 0 : i32
    %c0_i32_0 = arith.constant 0 : i32
    return %c0_i32, %arg0 : i32, i32
  }
}

module attributes {stable_mosaic.version = 11 : i64} {
  func.func @_bernstein_k3_kernel(%arg0: i32, %arg1: memref<4xf32, #tpu.memory_space<smem>>, %arg2: memref<128x128xf32, #tpu.memory_space<vmem>>, %arg3: memref<128x256xf32, #tpu.memory_space<vmem>>, %arg4: memref<128x256xf32, #tpu.memory_space<vmem>>) attributes {dimension_semantics = [#tpu.dimension_semantics<parallel>], iteration_bounds = array<i64: 1>, scalar_prefetch = 1 : i64, scratch_operands = 0 : i64, tpu.core_type = #tpu.core_type<tc>, window_params = [{pipeline_mode = #tpu.pipeline_mode<synchronous>, transform_indices = @transform_0, window_bounds = array<i64: 128, 128>}, {transform_indices = @transform_1, window_bounds = array<i64: 128, 256>}, {transform_indices = @transform_2, window_bounds = array<i64: 128, 256>}]} {
    %c0 = arith.constant 0 : index
    %c0_0 = arith.constant 0 : index
    %0 = vector.load %arg2[%c0, %c0_0] : memref<128x128xf32, #tpu.memory_space<vmem>>, vector<128x128xf32>
    %c0_1 = arith.constant 0 : index
    %c0_2 = arith.constant 0 : index
    %1 = vector.load %arg3[%c0_1, %c0_2] : memref<128x256xf32, #tpu.memory_space<vmem>>, vector<128x256xf32>
    %c0_3 = arith.constant 0 : index
    %2 = memref.load %arg1[%c0_3] : memref<4xf32, #tpu.memory_space<smem>>
    %3 = vector.broadcast %2 : f32 to vector<128x256xf32>
    %4 = arith.mulf %3, %1 : vector<128x256xf32>
    %cst = arith.constant dense<0.000000e+00> : vector<128x256xf32>
    %5 = tpu.matmul %0, %1, %cst {dimension_numbers = #tpu.dot_dimension_numbers<[1], [0], [0], [1], [0, 0, 1, 1], [], []>} : vector<128x128xf32>, vector<128x256xf32>, vector<128x256xf32> -> vector<128x256xf32>
    %c1 = arith.constant 1 : index
    %6 = memref.load %arg1[%c1] : memref<4xf32, #tpu.memory_space<smem>>
    %7 = vector.broadcast %6 : f32 to vector<128x256xf32>
    %8 = arith.mulf %7, %5 : vector<128x256xf32>
    %9 = arith.addf %4, %8 : vector<128x256xf32>
    %cst_4 = arith.constant dense<0.000000e+00> : vector<128x256xf32>
    %10 = tpu.matmul %0, %5, %cst_4 {dimension_numbers = #tpu.dot_dimension_numbers<[1], [0], [0], [1], [0, 0, 1, 1], [], []>} : vector<128x128xf32>, vector<128x256xf32>, vector<128x256xf32> -> vector<128x256xf32>
    %c2 = arith.constant 2 : index
    %11 = memref.load %arg1[%c2] : memref<4xf32, #tpu.memory_space<smem>>
    %12 = vector.broadcast %11 : f32 to vector<128x256xf32>
    %13 = arith.mulf %12, %10 : vector<128x256xf32>
    %14 = arith.addf %9, %13 : vector<128x256xf32>
    %cst_5 = arith.constant dense<0.000000e+00> : vector<128x256xf32>
    %15 = tpu.matmul %0, %10, %cst_5 {dimension_numbers = #tpu.dot_dimension_numbers<[1], [0], [0], [1], [0, 0, 1, 1], [], []>} : vector<128x128xf32>, vector<128x256xf32>, vector<128x256xf32> -> vector<128x256xf32>
    %c3 = arith.constant 3 : index
    %16 = memref.load %arg1[%c3] : memref<4xf32, #tpu.memory_space<smem>>
    %17 = vector.broadcast %16 : f32 to vector<128x256xf32>
    %18 = arith.mulf %17, %15 : vector<128x256xf32>
    %19 = arith.addf %14, %18 : vector<128x256xf32>
    %c0_6 = arith.constant 0 : index
    %c0_7 = arith.constant 0 : index
    %20 = vector.load %arg4[%c0_6, %c0_7] : memref<128x256xf32, #tpu.memory_space<vmem>>, vector<128x256xf32>
    tpu.vector_store %arg4[%c0_6, %c0_7], %19 {strides = array<i32>} : memref<128x256xf32, #tpu.memory_space<vmem>>, vector<128x256xf32>,
    return
  }
  func.func @transform_0(%arg0: i32, %arg1: memref<4xf32, #tpu.memory_space<smem>>) -> (i32, i32) {
    %c0_i32 = arith.constant 0 : i32
    %c0_i32_0 = arith.constant 0 : i32
    %c0_i32_1 = arith.constant 0 : i32
    return %c0_i32, %c0_i32_0 : i32, i32
  }
  func.func @transform_1(%arg0: i32, %arg1: memref<4xf32, #tpu.memory_space<smem>>) -> (i32, i32) {
    %c0_i32 = arith.constant 0 : i32
    %c0_i32_0 = arith.constant 0 : i32
    return %c0_i32, %arg0 : i32, i32
  }
  func.func @transform_2(%arg0: i32, %arg1: memref<4xf32, #tpu.memory_space<smem>>) -> (i32, i32) {
    %c0_i32 = arith.constant 0 : i32
    %c0_i32_0 = arith.constant 0 : i32
    return %c0_i32, %arg0 : i32, i32
  }
}

</mosaic_0001>

<bundles_post_ra>
// kernel: tpu_custom_call.1
= control target key start
LH: loop header
LB: loop body
LE: loop exit
PB: predicated region body
PF: predicated region fallthrough
CT: control target
= control target key end

     0   :  { %s978_s12 = smov [#allocation3]   ;;  %s1748_s0 = inlined_call_operand.hbm [shape: f32[4], index: 0, kind: input, shape index: {}]   ;;  %s1749_s1 = inlined_call_operand.hbm [shape: f32[128,128], index: 1, kind: input, shape index: {}]   ;;  %s1750_s2 = inlined_call_operand.hbm [shape: f32[128,256], index: 2, kind: input, shape index: {}]   ;;  %s1751_s3 = inlined_call_operand.hbm [shape: f32[128,256], index: 3, kind: output, shape index: {}]  }
   0x1   :  { %9 = dma.hbm_to_smem %s1748_s0, 16, %s978_s12, [#allocation2] }
   0x2   :  { %970 = dma.done.wait [#allocation2], 16 }
   0x3   :  { %971 = vsyncadd [#allocation2], 4294967280 }
   0x4   :  { %11 = sfence }
   0x5   :  { %12 = vsyncpa [#allocation5], 0 }
   0x6   :  { %13 = vsyncpa [#allocation8], 0 }
   0x7   :  { %14 = vsyncpa [#allocation6], 0  ;;  %s979_s15 = smov [#allocation4]  }
   0x8   :  { %s20_s16 = sshll.u32 %s979_s15, 4  ;;  %s21_s16 = int_to_ptr.vmem [resolvable:$true] %s20_s16 }
   0x9   :  { %s918_s17 = scalar_lea.vmem %s21_s16, 2048  ;;  %p923_p1 = scmp.lt.s32.totalorder %s21_s16, %s21_s16 }
   0xa   :  { %p919_p0 = scmp.ne.s32.totalorder %s21_s16, %s918_s17  ;;  %p924_p2 = scmp.lt.s32.totalorder %s918_s17, %s918_s17 }
   0xc   :  { %p925_p3 = por %p924_p2, %p923_p1 }
   0xe   :  { %p926_p4 = pnand %p925_p3, %p919_p0 }
  0x10   :  { %929 = shalt.err (!%p926_p4)
}
  0x11   :  { %s980_s18 = smov 128   ;;  %s981_s19 = smov 8  }
  0x12   :  { %26 = dma.hbm_to_vmem [thread:$0]  %s1749_s1, 2048, %s21_s16, [#allocation5], %s980_s18, %s980_s18, %s981_s19  }
  0x13   :  { %s982_s21 = smov [#allocation7]  }
  0x14   :  { %s32_s22 = sshll.u32 %s982_s21, 4  ;;  %s33_s22 = int_to_ptr.vmem [resolvable:$true] %s32_s22 }
  0x15   :  { %s938_s23 = scalar_lea.vmem %s33_s22, 4096  ;;  %p943_p6 = scmp.lt.s32.totalorder %s33_s22, %s33_s22 }
  0x16   :  { %p939_p5 = scmp.ne.s32.totalorder %s33_s22, %s938_s23  ;;  %p944_p7 = scmp.lt.s32.totalorder %s938_s23, %s938_s23 }
  0x18   :  { %p945_p8 = por %p944_p7, %p943_p6 }
  0x1a   :  { %p946_p9 = pnand %p945_p8, %p939_p5 }
  0x1c   :  { %949 = shalt.err (!%p946_p9)
}
  0x1d   :  { %s983_s24 = smov 256   ;;  %s984_s25 = smov 16  }
  0x1e   :  { %38 = dma.hbm_to_vmem [thread:$0]  %s1750_s2, 4096, %s33_s22, [#allocation8], %s983_s24, %s983_s24, %s984_s25  }
  0x1f   :  { %972 = dma.done.wait [#allocation5], 2048  }
  0x20   :  { %973 = vsyncadd [#allocation5], 4294965248 }
  0x21   :  { %974 = dma.done.wait [#allocation8], 4096  }
  0x22   :  { %975 = vsyncadd [#allocation8], 4294963200  ;;  %v1752_v0 = vmov 0.0   ;;  %v1021_v1 = vld [vmem:[#allocation7 + $0xf8] sm:$0xff]  ;;  %v1023_v2 = vld [vmem:[#allocation7 + $0xf0] sm:$0xff]  ;;  %s93_s1 = sld [smem:[#allocation3]] }
  0x23   :  { %239 = vmatprep.mubr.f32.mxu1 %v1752_v0  ;;  %191 = vmatprep.mubr.f32.mxu0 %v1752_v0  ;;  %1760 = vst [vmem:[#allocation14_spill] sm:$0xff] %v1021_v1  ;;  %v1025_v3 = vld [vmem:[#allocation7 + $0xe8] sm:$0xff]  ;;  %v1028_v4 = vld [vmem:[#allocation7 + $0xe0] sm:$0xff]  ;;  %v1032_v5 = vld [vmem:[#allocation7 + $0xd8] sm:$0xff]  ;;  %s858_s2 = sld [smem:[#allocation3 + $0x1]]  ;;  %s986_s30 = smov [#allocation9]  }
  0x24   :  { %861 = vmatprep.subr.mxu1 %v1021_v1  ;;  %127 = vmatprep.subr.mxu0 %v1021_v1  ;;  %v1036_v6 = vld [vmem:[#allocation7 + $0xd0] sm:$0xff]  ;;  %v1040_v7 = vld [vmem:[#allocation7 + $0xc8] sm:$0xff]  ;;  %v1044_v8 = vld [vmem:[#allocation7 + $0xc0] sm:$0xff]  ;;  %s859_s28 = sld [smem:[#allocation3 + $0x2]]  ;;  %s845_s4 = sshll.u32 %s986_s30, 4  ;;  %s846_s4 = int_to_ptr.vmem [resolvable:$true] %s845_s4 }
  0x25   :  { %877 = vmatpush1.msra.mxu1 %v1023_v2  ;;  %128 = vmatpush1.msra.mxu0 %v1023_v2  ;;  %v1048_v9 = vld [vmem:[#allocation7 + $0xb8] sm:$0xff]  ;;  %v1052_v10 = vld [vmem:[#allocation7 + $0xb0] sm:$0xff]  ;;  %v1056_v11 = vld [vmem:[#allocation7 + $0xa8] sm:$0xff]  ;;  %s860_s29 = sld [smem:[#allocation3 + $0x3]]  ;;  %s950_s5 = scalar_lea.vmem %s846_s4, 4096 }
  0x26   :  { %862 = vmatprep.subr.mxu1 %v1025_v3  ;;  %129 = vmatprep.subr.mxu0 %v1025_v3  ;;  %v1060_v12 = vld [vmem:[#allocation7 + $0xa0] sm:$0xff]  ;;  %v1064_v13 = vld [vmem:[#allocation7 + $0x98] sm:$0xff]  ;;  %v1068_v14 = vld [vmem:[#allocation7 + $0x90] sm:$0xff]  ;;  %p951_p10 = scmp.ne.s32.totalorder %s846_s4, %s950_s5  ;;  %p955_p11 = scmp.lt.s32.totalorder %s846_s4, %s846_s4 }
  0x27   :  { %878 = vmatpush1.msra.mxu1 %v1028_v4  ;;  %130 = vmatpush1.msra.mxu0 %v1028_v4  ;;  %v1072_v15 = vld [vmem:[#allocation7 + $0x88] sm:$0xff]  ;;  %v1076_v16 = vld [vmem:[#allocation7 + $0x80] sm:$0xff]  ;;  %v1080_v17 = vld [vmem:[#allocation7 + $0x78] sm:$0xff]  ;;  %p956_p12 = scmp.lt.s32.totalorder %s950_s5, %s950_s5 }
  0x28   :  { %863 = vmatprep.subr.mxu1 %v1032_v5  ;;  %131 = vmatprep.subr.mxu0 %v1032_v5  ;;  %1761 = vst [vmem:[#allocation15_spill] sm:$0xff] %v1080_v17  ;;  %v1084_v18 = vld [vmem:[#allocation7 + $0x70] sm:$0xff]  ;;  %v1088_v19 = vld [vmem:[#allocation7 + $0x68] sm:$0xff]  ;;  %v1092_v20 = vld [vmem:[#allocation7 + $0x60] sm:$0xff]  ;;  %v1209_v49 = vstv %s93_s1 }
  0x29   :  { %879 = vmatpush1.msra.mxu1 %v1036_v6  ;;  %132 = vmatpush1.msra.mxu0 %v1036_v6  ;;  %v1096_v21 = vld [vmem:[#allocation7 + $0x58] sm:$0xff]  ;;  %v1100_v22 = vld [vmem:[#allocation7 + $0x50] sm:$0xff]  ;;  %v1104_v23 = vld [vmem:[#allocation7 + $0x48] sm:$0xff]  ;;  %1764 = vst [vmem:[#allocation18_spill] sm:$0xff] %v1209_v49  ;;  %v1211_v50 = vstv %s858_s2  ;;  %v111_v51 = vmul.f32 %v1209_v49, %v1076_v16  ;;  %v112_v55 = vmul.f32 %v1209_v49, %v1072_v15  ;;  %p957_p13 = por %p956_p12, %p955_p11 }
  0x2a   :  { %864 = vmatprep.subr.mxu1 %v1040_v7  ;;  %133 = vmatprep.subr.mxu0 %v1040_v7  ;;  %v1108_v24 = vld [vmem:[#allocation7 + $0x40] sm:$0xff]  ;;  %v1112_v25 = vld [vmem:[#allocation7 + $0x38] sm:$0xff]  ;;  %v1116_v26 = vld [vmem:[#allocation7 + $0x30] sm:$0xff]  ;;  %v113_v59 = vmul.f32 %v1209_v49, %v1068_v14 }
  0x2b   :  { %880 = vmatpush1.msra.mxu1 %v1044_v8  ;;  %134 = vmatpush1.msra.mxu0 %v1044_v8  ;;  %v1120_v27 = vld [vmem:[#allocation7 + $0x28] sm:$0xff]  ;;  %v1124_v28 = vld [vmem:[#allocation7 + $0x20] sm:$0xff]  ;;  %v1128_v29 = vld [vmem:[#allocation7 + $0x18] sm:$0xff]  ;;  %p958_p0 = pnand %p957_p13, %p951_p10 }
  0x2c   :  { %865 = vmatprep.subr.mxu1 %v1048_v9  ;;  %135 = vmatprep.subr.mxu0 %v1048_v9  ;;  %v1132_v30 = vld [vmem:[#allocation7 + $0x10] sm:$0xff]  ;;  %v1136_v31 = vld [vmem:[#allocation7 + $0x8] sm:$0xff]  ;;  %v61_v32 = vld [vmem:[#allocation7] sm:$0xff] }
  0x2d   :  { %881 = vmatpush1.msra.mxu1 %v1052_v10  ;;  %136 = vmatpush1.msra.mxu0 %v1052_v10  ;;  %v1142_v33 = vld [vmem:[#allocation4 + $0x40] sm:$0xff]  ;;  %v1152_v35 = vld [vmem:[#allocation4 + $0x48] sm:$0xff]  ;;  %v1160_v37 = vld [vmem:[#allocation4 + $0x50] sm:$0xff]  ;;  %v95_v52 = vmul.f32 %v1209_v49, %v61_v32  ;;  %v96_v56 = vmul.f32 %v1209_v49, %v1136_v31  ;;  %v97_v60 = vmul.f32 %v1209_v49, %v1132_v30 }
  0x2e   :  { %866 = vmatprep.subr.mxu1 %v1056_v11  ;;  %137 = vmatprep.subr.mxu0 %v1056_v11  ;;  %v1145_v34 = vld [vmem:[#allocation4] sm:$0xff]  ;;  %v1155_v36 = vld [vmem:[#allocation4 + $0x8] sm:$0xff]  ;;  %v1163_v38 = vld [vmem:[#allocation4 + $0x10] sm:$0xff] }
  0x2f   :  { %882 = vmatpush1.msra.mxu1 %v1060_v12  ;;  %138 = vmatpush1.msra.mxu0 %v1060_v12  ;;  %v1168_v39 = vld [vmem:[#allocation4 + $0x58] sm:$0xff]  ;;  %v1176_v41 = vld [vmem:[#allocation4 + $0x60] sm:$0xff]  ;;  %v1184_v43 = vld [vmem:[#allocation4 + $0x68] sm:$0xff] }
  0x30   :  { %867 = vmatprep.subr.mxu1 %v1064_v13  ;;  %139 = vmatprep.subr.mxu0 %v1064_v13  ;;  %v1171_v40 = vld [vmem:[#allocation4 + $0x18] sm:$0xff]  ;;  %v1179_v42 = vld [vmem:[#allocation4 + $0x20] sm:$0xff]  ;;  %v1187_v44 = vld [vmem:[#allocation4 + $0x28] sm:$0xff] }
  0x31   :  { %883 = vmatpush1.msra.mxu1 %v1068_v14  ;;  %140 = vmatpush1.msra.mxu0 %v1068_v14  ;;  %v1192_v45 = vld [vmem:[#allocation4 + $0x70] sm:$0xff]  ;;  %v1200_v47 = vld [vmem:[#allocation4 + $0x78] sm:$0xff]  ;;  %v114_v14 = vmul.f32 %v1209_v49, %v1064_v13  ;;  %v115_v13 = vmul.f32 %v1209_v49, %v1060_v12  ;;  %v116_v12 = vmul.f32 %v1209_v49, %v1056_v11 }
  0x32   :  { %868 = vmatprep.subr.mxu1 %v1072_v15  ;;  %141 = vmatprep.subr.mxu0 %v1072_v15  ;;  %1762 = vst [vmem:[#allocation16_spill] sm:$0xff] %v1192_v45  ;;  %v1195_v46 = vld [vmem:[#allocation4 + $0x30] sm:$0xff]  ;;  %1763 = vst [vmem:[#allocation17_spill] sm:$0xff] %v1200_v47  ;;  %v1203_v48 = vld [vmem:[#allocation4 + $0x38] sm:$0xff]  ;;  %v117_v11 = vmul.f32 %v1209_v49, %v1052_v10  ;;  %v118_v10 = vmul.f32 %v1209_v49, %v1048_v9 }
  0x33   :  { %884 = vmatpush1.msra.mxu1 %v1076_v16  ;;  %142 = vmatpush1.msra.mxu0 %v1076_v16  ;;  %v119_v9 = vmul.f32 %v1209_v49, %v1044_v8  ;;  %v120_v8 = vmul.f32 %v1209_v49, %v1040_v7  ;;  %v105_v7 = vmul.f32 %v1209_v49, %v1100_v22 }
  0x34   :  { %869 = vmatprep.subr.mxu1 %v1080_v17  ;;  %143 = vmatprep.subr.mxu0 %v1080_v17 }
  0x35   :  { %885 = vmatpush1.msra.mxu1 %v1084_v18  ;;  %144 = vmatpush1.msra.mxu0 %v1084_v18 }
  0x36   :  { %870 = vmatprep.subr.mxu1 %v1088_v19  ;;  %145 = vmatprep.subr.mxu0 %v1088_v19 }
  0x37   :  { %886 = vmatpush1.msra.mxu1 %v1092_v20  ;;  %146 = vmatpush1.msra.mxu0 %v1092_v20 }
  0x38   :  { %871 = vmatprep.subr.mxu1 %v1096_v21  ;;  %147 = vmatprep.subr.mxu0 %v1096_v21 }
  0x39   :  { %887 = vmatpush1.msra.mxu1 %v1100_v22  ;;  %148 = vmatpush1.msra.mxu0 %v1100_v22 }
  0x3a   :  { %872 = vmatprep.subr.mxu1 %v1104_v23  ;;  %149 = vmatprep.subr.mxu0 %v1104_v23 }
  0x3b   :  { %888 = vmatpush1.msra.mxu1 %v1108_v24  ;;  %150 = vmatpush1.msra.mxu0 %v1108_v24 }
  0x3c   :  { %873 = vmatprep.subr.mxu1 %v1112_v25  ;;  %151 = vmatprep.subr.mxu0 %v1112_v25 }
  0x3d   :  { %889 = vmatpush1.msra.mxu1 %v1116_v26  ;;  %152 = vmatpush1.msra.mxu0 %v1116_v26 }
  0x3e   :  { %874 = vmatprep.subr.mxu1 %v1120_v27  ;;  %153 = vmatprep.subr.mxu0 %v1120_v27 }
  0x3f   :  { %890 = vmatpush1.msra.mxu1 %v1124_v28  ;;  %154 = vmatpush1.msra.mxu0 %v1124_v28 }
  0x40   :  { %875 = vmatprep.subr.mxu1 %v1128_v29  ;;  %155 = vmatprep.subr.mxu0 %v1128_v29 }
  0x41   :  { %891 = vmatpush1.msra.mxu1 %v1132_v30  ;;  %156 = vmatpush1.msra.mxu0 %v1132_v30  ;;  %v98_v30 = vmul.f32 %v1209_v49, %v1128_v29  ;;  %v99_v29 = vmul.f32 %v1209_v49, %v1124_v28  ;;  %v100_v28 = vmul.f32 %v1209_v49, %v1120_v27 }
  0x42   :  { %876 = vmatprep.subr.mxu1 %v1136_v31  ;;  %157 = vmatprep.subr.mxu0 %v1136_v31  ;;  %v101_v27 = vmul.f32 %v1209_v49, %v1116_v26  ;;  %v102_v26 = vmul.f32 %v1209_v49, %v1112_v25  ;;  %v103_v25 = vmul.f32 %v1209_v49, %v1108_v24 }
  0x43   :  { %892 = vmatpush1.msra.mxu1 %v61_v32  ;;  %158 = vmatpush1.msra.mxu0 %v61_v32  ;;  %v104_v24 = vmul.f32 %v1209_v49, %v1104_v23 }
  0x44   :  { %240 = vmatmul.mubr.f32.vlgmr.msra.gmra.mxu1 %v1142_v33  ;;  %192 = vmatmul.mubr.f32.vlgmr.msra.gmra.mxu0 %v1145_v34 }
  0x45   :  { %245 = vmatprep.mubr.f32.mxu1 %v1752_v0  ;;  %197 = vmatprep.mubr.f32.mxu0 %v1752_v0 }
  0x48   :  { %246 = vmatmul.mubr.f32.gmra.mxu1 %v1152_v35  ;;  %198 = vmatmul.mubr.f32.gmra.mxu0 %v1155_v36 }
  0x49   :  { %251 = vmatprep.mubr.f32.mxu1 %v1752_v0  ;;  %203 = vmatprep.mubr.f32.mxu0 %v1752_v0 }
  0x4c   :  { %252 = vmatmul.mubr.f32.gmra.mxu1 %v1160_v37  ;;  %204 = vmatmul.mubr.f32.gmra.mxu0 %v1163_v38 }
  0x4d   :  { %257 = vmatprep.mubr.f32.mxu1 %v1752_v0  ;;  %209 = vmatprep.mubr.f32.mxu0 %v1752_v0 }
  0x50   :  { %258 = vmatmul.mubr.f32.gmra.mxu1 %v1168_v39  ;;  %210 = vmatmul.mubr.f32.gmra.mxu0 %v1171_v40 }
  0x51   :  { %263 = vmatprep.mubr.f32.mxu1 %v1752_v0  ;;  %215 = vmatprep.mubr.f32.mxu0 %v1752_v0 }
  0x54   :  { %264 = vmatmul.mubr.f32.gmra.mxu1 %v1176_v41  ;;  %216 = vmatmul.mubr.f32.gmra.mxu0 %v1179_v42 }
  0x55   :  { %269 = vmatprep.mubr.f32.mxu1 %v1752_v0  ;;  %221 = vmatprep.mubr.f32.mxu0 %v1752_v0 }
  0x58   :  { %270 = vmatmul.mubr.f32.gmra.mxu1 %v1184_v43  ;;  %222 = vmatmul.mubr.f32.gmra.mxu0 %v1187_v44 }
  0x59   :  { %275 = vmatprep.mubr.f32.mxu1 %v1752_v0  ;;  %227 = vmatprep.mubr.f32.mxu0 %v1752_v0 }
  0x5c   :  { %276 = vmatmul.mubr.f32.gmra.mxu1 %v1192_v45  ;;  %228 = vmatmul.mubr.f32.gmra.mxu0 %v1195_v46 }
  0x5d   :  { %281 = vmatprep.mubr.f32.mxu1 %v1752_v0  ;;  %233 = vmatprep.mubr.f32.mxu0 %v1752_v0 }
  0x60   :  { %282 = vmatmul.mubr.f32.gmra.mxu1 %v1200_v47  ;;  %234 = vmatmul.mubr.f32.gmra.mxu0 %v1203_v48 }
  0x61   :  { %418 = vmatprep.mubr.f32.mxu1 %v1752_v0  ;;  %645 = vmatprep.mubr.f32.mxu0 %v1752_v0 }
 0x104   :  { %v1216_v53 = vpop.f32.mrf.mxu1  ;;  %v1218_v54 = vpop.f32.mrf.mxu0 }
 0x105   :  { %v306_v57 = vmul.f32 %v1211_v50, %v1216_v53  ;;  %v290_v58 = vmul.f32 %v1211_v50, %v1218_v54 }
 0x106   :  { %v1232_v61 = vpop.f32.mrf.mxu1  ;;  %v1234_v62 = vpop.f32.mrf.mxu0 }
 0x107   :  { %v1236_v63 = vadd.f32 %v306_v57, %v111_v51  ;;  %v307_v15 = vmul.f32 %v1211_v50, %v1232_v61  ;;  %v1240_v16 = vadd.f32 %v290_v58, %v95_v52  ;;  %v291_v31 = vmul.f32 %v1211_v50, %v1234_v62 }
 0x108   :  { %v1248_v32 = vpop.f32.mrf.mxu1  ;;  %v1250_v0 = vpop.f32.mrf.mxu0 }
 0x109   :  { %1765 = vst [vmem:[#allocation19_spill] sm:$0xff] %v1236_v63  ;;  %1766 = vst [vmem:[#allocation20_spill] sm:$0xff] %v1240_v16  ;;  %v1252_v51 = vadd.f32 %v307_v15, %v112_v55  ;;  %v308_v57 = vmul.f32 %v1211_v50, %v1248_v32  ;;  %v1256_v52 = vadd.f32 %v291_v31, %v96_v56 }
 0x10a   :  { %v292_v58 = vmul.f32 %v1211_v50, %v1250_v0  ;;  %v1264_v16 = vpop.f32.mrf.mxu1  ;;  %v1266_v1 = vpop.f32.mrf.mxu0 }
 0x10b   :  { %1767 = vst [vmem:[#allocation21_spill] sm:$0xff] %v1252_v51  ;;  %1768 = vst [vmem:[#allocation22_spill] sm:$0xff] %v1256_v52  ;;  %v1268_v55 = vadd.f32 %v308_v57, %v113_v59  ;;  %v309_v15 = vmul.f32 %v1211_v50, %v1264_v16  ;;  %v293_v31 = vmul.f32 %v1211_v50, %v1266_v1 }
 0x10c   :  { %v1272_v56 = vadd.f32 %v292_v58, %v97_v60  ;;  %v1280_v52 = vpop.f32.mrf.mxu1  ;;  %v1282_v51 = vpop.f32.mrf.mxu0 }
 0x10d   :  { %1769 = vst [vmem:[#allocation23_spill] sm:$0xff] %v1268_v55  ;;  %v1284_v59 = vadd.f32 %v309_v15, %v114_v14  ;;  %v310_v57 = vmul.f32 %v1211_v50, %v1280_v52  ;;  %v1288_v60 = vadd.f32 %v293_v31, %v98_v30  ;;  %v294_v58 = vmul.f32 %v1211_v50, %v1282_v51 }
 0x10e   :  { %1770 = vst [vmem:[#allocation24_spill] sm:$0xff] %v1272_v56  ;;  %v1296_v56 = vpop.f32.mrf.mxu1  ;;  %v1298_v55 = vpop.f32.mrf.mxu0 }
 0x10f   :  { %1771 = vst [vmem:[#allocation25_spill] sm:$0xff] %v1284_v59  ;;  %1772 = vst [vmem:[#allocation26_spill] sm:$0xff] %v1288_v60  ;;  %v1300_v14 = vadd.f32 %v310_v57, %v115_v13  ;;  %v311_v15 = vmul.f32 %v1211_v50, %v1296_v56  ;;  %v1304_v30 = vadd.f32 %v294_v58, %v99_v29 }
 0x110   :  { %v295_v31 = vmul.f32 %v1211_v50, %v1298_v55  ;;  %v1312_v60 = vpop.f32.mrf.mxu1  ;;  %v1314_v59 = vpop.f32.mrf.mxu0 }
 0x111   :  { %1773 = vst [vmem:[#allocation27_spill] sm:$0xff] %v1300_v14  ;;  %1774 = vst [vmem:[#allocation28_spill] sm:$0xff] %v1304_v30  ;;  %v1316_v13 = vadd.f32 %v311_v15, %v116_v12  ;;  %v312_v57 = vmul.f32 %v1211_v50, %v1312_v60  ;;  %v296_v58 = vmul.f32 %v1211_v50, %v1314_v59 }
 0x112   :  { %v1320_v29 = vadd.f32 %v295_v31, %v100_v28  ;;  %v1328_v30 = vpop.f32.mrf.mxu1  ;;  %v1330_v14 = vpop.f32.mrf.mxu0 }
 0x113   :  { %1775 = vst [vmem:[#allocation29_spill] sm:$0xff] %v1316_v13  ;;  %v1332_v12 = vadd.f32 %v312_v57, %v117_v11  ;;  %v313_v15 = vmul.f32 %v1211_v50, %v1328_v30  ;;  %v1336_v28 = vadd.f32 %v296_v58, %v101_v27  ;;  %v297_v31 = vmul.f32 %v1211_v50, %v1330_v14 }
 0x114   :  { %1776 = vst [vmem:[#allocation30_spill] sm:$0xff] %v1320_v29  ;;  %v265_v29 = vpop.f32.mrf.mxu1  ;;  %v1344_v13 = vpop.f32.mrf.mxu0  ;;  %v121_v58 = vmul.f32 %v1209_v49, %v1036_v6  ;;  %v106_v6 = vmul.f32 %v1209_v49, %v1096_v21 }
 0x115   :  { %1777 = vst [vmem:[#allocation31_spill] sm:$0xff] %v1332_v12  ;;  %1778 = vst [vmem:[#allocation32_spill] sm:$0xff] %v1336_v28  ;;  %v1346_v63 = vadd.f32 %v313_v15, %v118_v10  ;;  %v314_v11 = vmul.f32 %v1211_v50, %v265_v29  ;;  %v1349_v57 = vadd.f32 %v297_v31, %v102_v26 }
 0x116   :  { %v298_v27 = vmul.f32 %v1211_v50, %v1344_v13  ;;  %v267_v28 = vpop.f32.mrf.mxu1  ;;  %v1357_v23 = vpop.f32.mrf.mxu0  ;;  %v122_v31 = vmul.f32 %v1209_v49, %v1032_v5 }
 0x117   :  { %1779 = vst [vmem:[#allocation33_spill] sm:$0xff] %v1346_v63  ;;  %1780 = vst [vmem:[#allocation34_spill] sm:$0xff] %v1349_v57  ;;  %v1359_v12 = vadd.f32 %v314_v11, %v119_v9  ;;  %v315_v10 = vmul.f32 %v1211_v50, %v267_v28  ;;  %v299_v26 = vmul.f32 %v1211_v50, %v1357_v23 }
 0x118   :  { %v1362_v15 = vadd.f32 %v298_v27, %v103_v25  ;;  %v271_v57 = vpop.f32.mrf.mxu1  ;;  %v223_v22 = vpop.f32.mrf.mxu0  ;;  %v123_v27 = vmul.f32 %v1209_v49, %v1028_v4 }
 0x119   :  { %1781 = vst [vmem:[#allocation35_spill] sm:$0xff] %v1359_v12  ;;  %v1370_v63 = vadd.f32 %v315_v10, %v120_v8  ;;  %v316_v9 = vmul.f32 %v1211_v50, %v271_v57  ;;  %v1373_v11 = vadd.f32 %v299_v26, %v104_v24  ;;  %v300_v25 = vmul.f32 %v1211_v50, %v223_v22 }
 0x11a   :  { %1782 = vst [vmem:[#allocation36_spill] sm:$0xff] %v1362_v15  ;;  %v107_v15 = vmul.f32 %v1209_v49, %v1092_v20  ;;  %v273_v5 = vpop.f32.mrf.mxu1  ;;  %v225_v12 = vpop.f32.mrf.mxu0  ;;  %v124_v24 = vmul.f32 %v1209_v49, %v1025_v3  ;;  %v108_v26 = vmul.f32 %v1209_v49, %v1088_v19 }
 0x11b   :  { %1783 = vst [vmem:[#allocation37_spill] sm:$0xff] %v1370_v63  ;;  %1784 = vst [vmem:[#allocation38_spill] sm:$0xff] %v1373_v11  ;;  %v1380_v17 = vadd.f32 %v316_v9, %v121_v58  ;;  %v317_v21 = vmul.f32 %v1211_v50, %v273_v5  ;;  %v1383_v8 = vadd.f32 %v300_v25, %v105_v7 }
 0x11c   :  { %v301_v10 = vmul.f32 %v1211_v50, %v225_v12  ;;  %v277_v4 = vpop.f32.mrf.mxu1  ;;  %v229_v11 = vpop.f32.mrf.mxu0  ;;  %v125_v7 = vmul.f32 %v1209_v49, %v1023_v2  ;;  %v109_v25 = vmul.f32 %v1209_v49, %v1084_v18 }
 0x11d   :  { %1785 = vst [vmem:[#allocation39_spill] sm:$0xff] %v1380_v17  ;;  %1786 = vst [vmem:[#allocation40_spill] sm:$0xff] %v1383_v8  ;;  %v1390_v63 = vadd.f32 %v317_v21, %v122_v31  ;;  %v318_v20 = vmul.f32 %v1211_v50, %v277_v4  ;;  %v302_v9 = vmul.f32 %v1211_v50, %v229_v11 }
 0x11e   :  { %v1393_v58 = vadd.f32 %v301_v10, %v106_v6  ;;  %v279_v3 = vpop.f32.mrf.mxu1  ;;  %v231_v17 = vpop.f32.mrf.mxu0 }
 0x11f   :  { %1787 = vst [vmem:[#allocation41_spill] sm:$0xff] %v1390_v63  ;;  %v1400_v8 = vadd.f32 %v318_v20, %v123_v27  ;;  %v319_v19 = vmul.f32 %v1211_v50, %v279_v3  ;;  %v1403_v31 = vadd.f32 %v302_v9, %v107_v15  ;;  %v303_v21 = vmul.f32 %v1211_v50, %v231_v17 }
 0x120   :  { %1788 = vst [vmem:[#allocation42_spill] sm:$0xff] %v1393_v58  ;;  %v283_v6 = vpop.f32.mrf.mxu1  ;;  %v235_v10 = vpop.f32.mrf.mxu0 }
 0x121   :  { %v1406_v63 = vadd.f32 %v319_v19, %v124_v24  ;;  %v320_v58 = vmul.f32 %v1211_v50, %v283_v6  ;;  %v1409_v2 = vadd.f32 %v303_v21, %v108_v26  ;;  %v304_v18 = vmul.f32 %v1211_v50, %v235_v10 }
 0x122   :  { %v1412_v49 = vpop.f32.mrf.mxu1  ;;  %v1426_v24 = vpop.f32.mrf.mxu0 }
 0x123   :  { %v1414_v27 = vadd.f32 %v320_v58, %v125_v7  ;;  %354 = vmatprep.subr.mxu1 %v1412_v49  ;;  %v1417_v15 = vadd.f32 %v304_v18, %v109_v25  ;;  %v305_v26 = vmul.f32 %v1211_v50, %v1426_v24  ;;  %v1800_v18 = vld [vmem:[#allocation19_spill] sm:$0xff] }
 0x124   :  { %355 = vmatpush1.msra.mxu1 %v283_v6 }
 0x125   :  { %356 = vmatprep.subr.mxu1 %v279_v3 }
 0x126   :  { %357 = vmatpush1.msra.mxu1 %v277_v4 }
 0x127   :  { %358 = vmatprep.subr.mxu1 %v273_v5 }
 0x128   :  { %359 = vmatpush1.msra.mxu1 %v271_v57 }
 0x129   :  { %360 = vmatprep.subr.mxu1 %v267_v28 }
 0x12a   :  { %361 = vmatpush1.msra.mxu1 %v265_v29 }
 0x12b   :  { %362 = vmatprep.subr.mxu1 %v1328_v30 }
 0x12c   :  { %363 = vmatpush1.msra.mxu1 %v1312_v60 }
 0x12d   :  { %364 = vmatprep.subr.mxu1 %v1296_v56 }
 0x12e   :  { %365 = vmatpush1.msra.mxu1 %v1280_v52 }
 0x12f   :  { %366 = vmatprep.subr.mxu1 %v1264_v16 }
 0x130   :  { %367 = vmatpush1.msra.mxu1 %v1248_v32 }
 0x131   :  { %368 = vmatprep.subr.mxu1 %v1232_v61 }
 0x132   :  { %369 = vmatpush1.msra.mxu1 %v1216_v53 }
 0x133   :  { %370 = vmatprep.subr.mxu1 %v1426_v24 }
 0x134   :  { %371 = vmatpush1.msra.mxu1 %v235_v10 }
 0x135   :  { %372 = vmatprep.subr.mxu1 %v231_v17  ;;  %v1789_v17 = vmov 0.0  }
 0x136   :  { %373 = vmatpush1.msra.mxu1 %v229_v11  ;;  %v1795_v11 = vld [vmem:[#allocation18_spill] sm:$0xff] }
 0x137   :  { %374 = vmatprep.subr.mxu1 %v225_v12  ;;  %v1792_v12 = vld [vmem:[#allocation42_spill] sm:$0xff] }
 0x138   :  { %375 = vmatpush1.msra.mxu1 %v223_v22  ;;  %v1794_v22 = vld [vmem:[#allocation15_spill] sm:$0xff] }
 0x139   :  { %376 = vmatprep.subr.mxu1 %v1357_v23  ;;  %v110_v5 = vmul.f32 %v1795_v11, %v1794_v22  ;;  %v1804_v22 = vld [vmem:[#allocation23_spill] sm:$0xff] }
 0x13a   :  { %377 = vmatpush1.msra.mxu1 %v1344_v13 }
 0x13b   :  { %378 = vmatprep.subr.mxu1 %v1330_v14  ;;  %v1790_v14 = vld [vmem:[#allocation40_spill] sm:$0xff]  ;;  %v337_v3 = vadd.f32 %v305_v26, %v110_v5 }
 0x13c   :  { %379 = vmatpush1.msra.mxu1 %v1314_v59 }
 0x13d   :  { %380 = vmatprep.subr.mxu1 %v1298_v55  ;;  %v1491_v55 = vstv %s859_s28 }
 0x13e   :  { %381 = vmatpush1.msra.mxu1 %v1282_v51 }
 0x13f   :  { %382 = vmatprep.subr.mxu1 %v1266_v1 }
 0x140   :  { %383 = vmatpush1.msra.mxu1 %v1250_v0 }
 0x141   :  { %384 = vmatprep.subr.mxu1 %v1234_v62 }
 0x142   :  { %385 = vmatpush1.msra.mxu1 %v1218_v54 }
 0x143   :  { %419 = vmatmul.mubr.f32.vlgmr.msra.gmra.mxu1 %v1145_v34 }
 0x144   :  { %424 = vmatprep.mubr.f32.mxu1 %v1789_v17 }
 0x147   :  { %425 = vmatmul.mubr.f32.gmra.mxu1 %v1155_v36 }
 0x148   :  { %430 = vmatprep.mubr.f32.mxu1 %v1789_v17 }
 0x14b   :  { %431 = vmatmul.mubr.f32.gmra.mxu1 %v1163_v38 }
 0x14c   :  { %436 = vmatprep.mubr.f32.mxu1 %v1789_v17 }
 0x14f   :  { %437 = vmatmul.mubr.f32.gmra.mxu1 %v1171_v40 }
 0x150   :  { %442 = vmatprep.mubr.f32.mxu1 %v1789_v17 }
 0x153   :  { %443 = vmatmul.mubr.f32.gmra.mxu1 %v1179_v42 }
 0x154   :  { %448 = vmatprep.mubr.f32.mxu1 %v1789_v17 }
 0x157   :  { %449 = vmatmul.mubr.f32.gmra.mxu1 %v1187_v44 }
 0x158   :  { %454 = vmatprep.mubr.f32.mxu1 %v1789_v17 }
 0x15b   :  { %455 = vmatmul.mubr.f32.gmra.mxu1 %v1195_v46 }
 0x15c   :  { %460 = vmatprep.mubr.f32.mxu1 %v1789_v17 }
 0x15f   :  { %461 = vmatmul.mubr.f32.gmra.mxu1 %v1203_v48 }
 0x160   :  { %466 = vmatprep.mubr.f32.mxu1 %v1789_v17 }
 0x163   :  { %467 = vmatmul.mubr.f32.gmra.mxu1 %v1142_v33 }
 0x164   :  { %472 = vmatprep.mubr.f32.mxu1 %v1789_v17 }
 0x167   :  { %473 = vmatmul.mubr.f32.gmra.mxu1 %v1152_v35 }
 0x168   :  { %478 = vmatprep.mubr.f32.mxu1 %v1789_v17 }
 0x16b   :  { %479 = vmatmul.mubr.f32.gmra.mxu1 %v1160_v37 }
 0x16c   :  { %484 = vmatprep.mubr.f32.mxu1 %v1789_v17 }
 0x16f   :  { %485 = vmatmul.mubr.f32.gmra.mxu1 %v1168_v39 }
 0x170   :  { %490 = vmatprep.mubr.f32.mxu1 %v1789_v17 }
 0x173   :  { %491 = vmatmul.mubr.f32.gmra.mxu1 %v1176_v41 }
 0x174   :  { %496 = vmatprep.mubr.f32.mxu1 %v1789_v17 }
 0x177   :  { %497 = vmatmul.mubr.f32.gmra.mxu1 %v1184_v43 }
 0x178   :  { %502 = vmatprep.mubr.f32.mxu1 %v1789_v17 }
 0x17b   :  { %503 = vmatmul.mubr.f32.gmra.mxu1 %v1192_v45 }
 0x17c   :  { %508 = vmatprep.mubr.f32.mxu1 %v1789_v17 }
 0x17f   :  { %509 = vmatmul.mubr.f32.gmra.mxu1 %v1200_v47 }
 0x203   :  { %v1471_v0 = vpop.f32.mrf.mxu1 }
 0x205   :  { %v1473_v1 = vpop.f32.mrf.mxu1 }
 0x207   :  { %v1475_v53 = vpop.f32.mrf.mxu1 }
 0x209   :  { %v1477_v54 = vpop.f32.mrf.mxu1 }
 0x20b   :  { %v1479_v61 = vpop.f32.mrf.mxu1 }
 0x20d   :  { %v1481_v62 = vpop.f32.mrf.mxu1 }
 0x20f   :  { %v1483_v16 = vpop.f32.mrf.mxu1 }
 0x211   :  { %v1485_v32 = vpop.f32.mrf.mxu1 }
 0x213   :  { %v1487_v51 = vpop.f32.mrf.mxu1 }
 0x215   :  { %v1489_v52 = vpop.f32.mrf.mxu1 }
 0x217   :  { %v1493_v56 = vpop.f32.mrf.mxu1 }
 0x218   :  { %v527_v59 = vmul.f32 %v1491_v55, %v1493_v56 }
 0x219   :  { %v1497_v60 = vpop.f32.mrf.mxu1 }
 0x21a   :  { %v1500_v30 = vadd.f32 %v527_v59, %v1790_v14  ;;  %v528_v13 = vmul.f32 %v1491_v55, %v1497_v60 }
 0x21b   :  { %v1504_v29 = vpop.f32.mrf.mxu1 }
 0x21c   :  { %1791 = vst [vmem:[#allocation40_spill] sm:$0xff] %v1500_v30  ;;  %v1507_v28 = vadd.f32 %v528_v13, %v1792_v12  ;;  %v529_v57 = vmul.f32 %v1491_v55, %v1504_v29  ;;  %v1802_v13 = vld [vmem:[#allocation21_spill] sm:$0xff] }
 0x21d   :  { %v1511_v23 = vpop.f32.mrf.mxu1 }
 0x21e   :  { %1793 = vst [vmem:[#allocation42_spill] sm:$0xff] %v1507_v28  ;;  %v1518_v4 = vadd.f32 %v529_v57, %v1403_v31  ;;  %v530_v20 = vmul.f32 %v1491_v55, %v1511_v23 }
 0x21f   :  { %v1522_v58 = vpop.f32.mrf.mxu1 }
 0x220   :  { %1796 = vst [vmem:[#allocation15_spill] sm:$0xff] %v1518_v4  ;;  %v1525_v9 = vadd.f32 %v530_v20, %v1409_v2  ;;  %v531_v7 = vmul.f32 %v1491_v55, %v1522_v58 }
 0x221   :  { %v1529_v25 = vpop.f32.mrf.mxu1 }
 0x222   :  { %1797 = vst [vmem:[#allocation18_spill] sm:$0xff] %v1525_v9  ;;  %v1532_v19 = vadd.f32 %v531_v7, %v1417_v15  ;;  %v532_v31 = vmul.f32 %v1491_v55, %v1529_v25  ;;  %v1806_v7 = vld [vmem:[#allocation25_spill] sm:$0xff] }
 0x223   :  { %v1536_v21 = vpop.f32.mrf.mxu1 }
 0x224   :  { %1798 = vst [vmem:[#allocation43_spill] sm:$0xff] %v1532_v19  ;;  %v1538_v6 = vadd.f32 %v532_v31, %v337_v3  ;;  %v533_v10 = vmul.f32 %v1491_v55, %v1536_v21 }
 0x225   :  { %v470_v2 = vpop.f32.mrf.mxu1 }
 0x226   :  { %1799 = vst [vmem:[#allocation44_spill] sm:$0xff] %v1538_v6  ;;  %v1543_v24 = vadd.f32 %v533_v10, %v1800_v18  ;;  %v534_v59 = vmul.f32 %v1491_v55, %v470_v2  ;;  %v1808_v18 = vld [vmem:[#allocation27_spill] sm:$0xff] }
 0x227   :  { %v474_v14 = vpop.f32.mrf.mxu1 }
 0x228   :  { %1801 = vst [vmem:[#allocation19_spill] sm:$0xff] %v1543_v24  ;;  %v1547_v15 = vadd.f32 %v534_v59, %v1802_v13  ;;  %v535_v12 = vmul.f32 %v1491_v55, %v474_v14 }
 0x229   :  { %v476_v57 = vpop.f32.mrf.mxu1 }
 0x22a   :  { %1803 = vst [vmem:[#allocation21_spill] sm:$0xff] %v1547_v15  ;;  %v1551_v5 = vadd.f32 %v535_v12, %v1804_v22  ;;  %v536_v26 = vmul.f32 %v1491_v55, %v476_v57  ;;  %v1810_v15 = vld [vmem:[#allocation29_spill] sm:$0xff] }
 0x22b   :  { %v480_v20 = vpop.f32.mrf.mxu1 }
 0x22c   :  { %1805 = vst [vmem:[#allocation23_spill] sm:$0xff] %v1551_v5  ;;  %v1555_v3 = vadd.f32 %v536_v26, %v1806_v7  ;;  %v537_v31 = vmul.f32 %v1491_v55, %v480_v20  ;;  %v1812_v5 = vld [vmem:[#allocation31_spill] sm:$0xff] }
 0x22d   :  { %v482_v10 = vpop.f32.mrf.mxu1 }
 0x22e   :  { %1807 = vst [vmem:[#allocation25_spill] sm:$0xff] %v1555_v3  ;;  %v1559_v24 = vadd.f32 %v537_v31, %v1808_v18  ;;  %v538_v59 = vmul.f32 %v1491_v55, %v482_v10  ;;  %v1814_v3 = vld [vmem:[#allocation33_spill] sm:$0xff] }
 0x22f   :  { %v486_v13 = vpop.f32.mrf.mxu1 }
 0x230   :  { %1809 = vst [vmem:[#allocation27_spill] sm:$0xff] %v1559_v24  ;;  %v1563_v6 = vadd.f32 %v538_v59, %v1810_v15  ;;  %v539_v12 = vmul.f32 %v1491_v55, %v486_v13  ;;  %v1816_v24 = vld [vmem:[#allocation35_spill] sm:$0xff] }
 0x231   :  { %v488_v22 = vpop.f32.mrf.mxu1 }
 0x232   :  { %1811 = vst [vmem:[#allocation29_spill] sm:$0xff] %v1563_v6  ;;  %v1567_v19 = vadd.f32 %v539_v12, %v1812_v5  ;;  %v540_v26 = vmul.f32 %v1491_v55, %v488_v22  ;;  %v1818_v6 = vld [vmem:[#allocation37_spill] sm:$0xff] }
 0x233   :  { %v492_v7 = vpop.f32.mrf.mxu1 }
 0x234   :  { %1813 = vst [vmem:[#allocation31_spill] sm:$0xff] %v1567_v19  ;;  %v1571_v9 = vadd.f32 %v540_v26, %v1814_v3  ;;  %v541_v31 = vmul.f32 %v1491_v55, %v492_v7  ;;  %v1820_v19 = vld [vmem:[#allocation39_spill] sm:$0xff] }
 0x235   :  { %v494_v18 = vpop.f32.mrf.mxu1 }
 0x236   :  { %1815 = vst [vmem:[#allocation33_spill] sm:$0xff] %v1571_v9  ;;  %v1575_v4 = vadd.f32 %v541_v31, %v1816_v24  ;;  %v542_v15 = vmul.f32 %v1491_v55, %v494_v18  ;;  %v1822_v9 = vld [vmem:[#allocation41_spill] sm:$0xff] }
 0x237   :  { %v498_v59 = vpop.f32.mrf.mxu1 }
 0x238   :  { %1817 = vst [vmem:[#allocation35_spill] sm:$0xff] %v1575_v4  ;;  %v1579_v28 = vadd.f32 %v542_v15, %v1818_v6  ;;  %v543_v5 = vmul.f32 %v1491_v55, %v498_v59  ;;  %v1824_v4 = vld [vmem:[#allocation14_spill] sm:$0xff]  ;;  %v321_v6 = vmul.f32 %v1211_v50, %v1412_v49 }
 0x239   :  { %v500_v12 = vpop.f32.mrf.mxu1  ;;  %v126_v45 = vmul.f32 %v1795_v11, %v1824_v4  ;;  %v1831_v4 = vld [vmem:[#allocation28_spill] sm:$0xff] }
 0x23a   :  { %1819 = vst [vmem:[#allocation37_spill] sm:$0xff] %v1579_v28  ;;  %v1583_v30 = vadd.f32 %v543_v5, %v1820_v19  ;;  %v544_v3 = vmul.f32 %v1491_v55, %v500_v12 }
 0x23b   :  { %v504_v26 = vpop.f32.mrf.mxu1 }
 0x23c   :  { %1821 = vst [vmem:[#allocation39_spill] sm:$0xff] %v1583_v30  ;;  %v1587_v47 = vadd.f32 %v544_v3, %v1822_v9  ;;  %v545_v24 = vmul.f32 %v1491_v55, %v504_v26 }
 0x23d   :  { %v506_v31 = vpop.f32.mrf.mxu1 }
 0x23e   :  { %1823 = vst [vmem:[#allocation41_spill] sm:$0xff] %v1587_v47  ;;  %v1595_v15 = vadd.f32 %v545_v24, %v1400_v8  ;;  %v546_v19 = vmul.f32 %v1491_v55, %v506_v31  ;;  %v353_v47 = vadd.f32 %v321_v6, %v126_v45 }
 0x23f   :  { %v510_v5 = vpop.f32.mrf.mxu1 }
 0x240   :  { %v1599_v30 = vadd.f32 %v546_v19, %v1406_v63  ;;  %v547_v9 = vmul.f32 %v1491_v55, %v510_v5  ;;  %v1829_v63 = vld [vmem:[#allocation24_spill] sm:$0xff] }
 0x241   :  { %v512_v3 = vpop.f32.mrf.mxu1 }
 0x242   :  { %v1603_v28 = vadd.f32 %v547_v9, %v1414_v27  ;;  %v548_v11 = vmul.f32 %v1491_v55, %v512_v3  ;;  %581 = vmatprep.subr.mxu0 %v512_v3  ;;  %v521_v27 = vmul.f32 %v1491_v55, %v1479_v61 }
 0x243   :  { %582 = vmatpush1.msra.mxu0 %v510_v5  ;;  %v1835_v5 = vld [vmem:[#allocation36_spill] sm:$0xff] }
 0x244   :  { %v1606_v49 = vadd.f32 %v548_v11, %v353_v47  ;;  %583 = vmatprep.subr.mxu0 %v506_v31 }
 0x245   :  { %584 = vmatpush1.msra.mxu0 %v504_v26  ;;  %v1834_v26 = vld [vmem:[#allocation34_spill] sm:$0xff] }
 0x246   :  { %585 = vmatprep.subr.mxu0 %v500_v12 }
 0x247   :  { %586 = vmatpush1.msra.mxu0 %v498_v59 }
 0x248   :  { %587 = vmatprep.subr.mxu0 %v494_v18 }
 0x249   :  { %588 = vmatpush1.msra.mxu0 %v492_v7 }
 0x24a   :  { %589 = vmatprep.subr.mxu0 %v488_v22  ;;  %v1833_v22 = vld [vmem:[#allocation32_spill] sm:$0xff] }
 0x24b   :  { %590 = vmatpush1.msra.mxu0 %v486_v13 }
 0x24c   :  { %591 = vmatprep.subr.mxu0 %v482_v10 }
 0x24d   :  { %592 = vmatpush1.msra.mxu0 %v480_v20 }
 0x24e   :  { %593 = vmatprep.subr.mxu0 %v476_v57 }
 0x24f   :  { %594 = vmatpush1.msra.mxu0 %v474_v14  ;;  %v1832_v14 = vld [vmem:[#allocation30_spill] sm:$0xff] }
 0x250   :  { %595 = vmatprep.subr.mxu0 %v470_v2 }
 0x251   :  { %596 = vmatpush1.msra.mxu0 %v1536_v21 }
 0x252   :  { %597 = vmatprep.subr.mxu0 %v1529_v25 }
 0x253   :  { %598 = vmatpush1.msra.mxu0 %v1522_v58  ;;  %v553_v58 = vadd.f32 %v521_v27, %v1831_v4  ;;  %v1840_v27 = vld [vmem:[#allocation18_spill] sm:$0xff] }
 0x254   :  { %599 = vmatprep.subr.mxu0 %v1511_v23 }
 0x255   :  { %600 = vmatpush1.msra.mxu0 %v1504_v29 }
 0x256   :  { %601 = vmatprep.subr.mxu0 %v1497_v60  ;;  %v522_v60 = vmul.f32 %v1491_v55, %v1481_v62 }
 0x257   :  { %602 = vmatpush1.msra.mxu0 %v1493_v56 }
 0x258   :  { %603 = vmatprep.subr.mxu0 %v1489_v52  ;;  %v554_v57 = vadd.f32 %v522_v60, %v1832_v14  ;;  %v1844_v14 = vld [vmem:[#allocation21_spill] sm:$0xff] }
 0x259   :  { %604 = vmatpush1.msra.mxu0 %v1487_v51 }
 0x25a   :  { %605 = vmatprep.subr.mxu0 %v1485_v32 }
 0x25b   :  { %606 = vmatpush1.msra.mxu0 %v1483_v16 }
 0x25c   :  { %607 = vmatprep.subr.mxu0 %v1481_v62  ;;  %v524_v62 = vmul.f32 %v1491_v55, %v1485_v32  ;;  %v526_v32 = vmul.f32 %v1491_v55, %v1489_v52 }
 0x25d   :  { %608 = vmatpush1.msra.mxu0 %v1479_v61  ;;  %v523_v61 = vmul.f32 %v1491_v55, %v1483_v16  ;;  %v525_v16 = vmul.f32 %v1491_v55, %v1487_v51 }
 0x25e   :  { %609 = vmatprep.subr.mxu0 %v1477_v54  ;;  %v556_v24 = vadd.f32 %v524_v62, %v1834_v26  ;;  %v1847_v26 = vld [vmem:[#allocation27_spill] sm:$0xff] }
 0x25f   :  { %610 = vmatpush1.msra.mxu0 %v1475_v53  ;;  %v555_v7 = vadd.f32 %v523_v61, %v1833_v22  ;;  %v557_v9 = vadd.f32 %v525_v16, %v1835_v5  ;;  %v1843_v61 = vld [vmem:[#allocation19_spill] sm:$0xff]  ;;  %v1846_v16 = vld [vmem:[#allocation25_spill] sm:$0xff] }
 0x260   :  { %611 = vmatprep.subr.mxu0 %v1473_v1 }
 0x261   :  { %612 = vmatpush1.msra.mxu0 %v1471_v0 }
 0x262   :  { %646 = vmatmul.mubr.f32.vlgmr.msra.gmra.mxu0 %v1145_v34  ;;  %v1826_v34 = vld [vmem:[#allocation17_spill] sm:$0xff] }
 0x263   :  { %651 = vmatprep.mubr.f32.mxu0 %v1789_v17 }
 0x266   :  { %652 = vmatmul.mubr.f32.gmra.mxu0 %v1155_v36  ;;  %v1658_v36 = vstv %s860_s29 }
 0x267   :  { %657 = vmatprep.mubr.f32.mxu0 %v1789_v17 }
 0x26a   :  { %658 = vmatmul.mubr.f32.gmra.mxu0 %v1163_v38 }
 0x26b   :  { %663 = vmatprep.mubr.f32.mxu0 %v1789_v17 }
 0x26e   :  { %664 = vmatmul.mubr.f32.gmra.mxu0 %v1171_v40 }
 0x26f   :  { %669 = vmatprep.mubr.f32.mxu0 %v1789_v17 }
 0x272   :  { %670 = vmatmul.mubr.f32.gmra.mxu0 %v1179_v42 }
 0x273   :  { %675 = vmatprep.mubr.f32.mxu0 %v1789_v17 }
 0x276   :  { %676 = vmatmul.mubr.f32.gmra.mxu0 %v1187_v44  ;;  %v1828_v44 = vld [vmem:[#allocation22_spill] sm:$0xff] }
 0x277   :  { %681 = vmatprep.mubr.f32.mxu0 %v1789_v17 }
 0x27a   :  { %682 = vmatmul.mubr.f32.gmra.mxu0 %v1195_v46  ;;  %v520_v46 = vmul.f32 %v1491_v55, %v1477_v54 }
 0x27b   :  { %687 = vmatprep.mubr.f32.mxu0 %v1789_v17 }
 0x27e   :  { %688 = vmatmul.mubr.f32.gmra.mxu0 %v1203_v48 }
 0x27f   :  { %693 = vmatprep.mubr.f32.mxu0 %v1789_v17 }
 0x282   :  { %694 = vmatmul.mubr.f32.gmra.mxu0 %v1142_v33  ;;  %v1825_v33 = vld [vmem:[#allocation16_spill] sm:$0xff] }
 0x283   :  { %699 = vmatprep.mubr.f32.mxu0 %v1789_v17 }
 0x286   :  { %700 = vmatmul.mubr.f32.gmra.mxu0 %v1152_v35  ;;  %v517_v35 = vmul.f32 %v1491_v55, %v1471_v0 }
 0x287   :  { %705 = vmatprep.mubr.f32.mxu0 %v1789_v17 }
 0x28a   :  { %706 = vmatmul.mubr.f32.gmra.mxu0 %v1160_v37  ;;  %v518_v37 = vmul.f32 %v1491_v55, %v1473_v1 }
 0x28b   :  { %711 = vmatprep.mubr.f32.mxu0 %v1789_v17 }
 0x28c   :  { %v550_v45 = vadd.f32 %v518_v37, %v1828_v44  ;;  %v1838_v44 = vld [vmem:[#allocation42_spill] sm:$0xff] }
 0x28e   :  { %712 = vmatmul.mubr.f32.gmra.mxu0 %v1168_v39  ;;  %v1827_v39 = vld [vmem:[#allocation20_spill] sm:$0xff] }
 0x28f   :  { %717 = vmatprep.mubr.f32.mxu0 %v1789_v17  ;;  %v549_v40 = vadd.f32 %v517_v35, %v1827_v39 }
 0x292   :  { %718 = vmatmul.mubr.f32.gmra.mxu0 %v1176_v41  ;;  %v519_v41 = vmul.f32 %v1491_v55, %v1475_v53  ;;  %v1830_v53 = vld [vmem:[#allocation26_spill] sm:$0xff] }
 0x293   :  { %723 = vmatprep.mubr.f32.mxu0 %v1789_v17  ;;  %v552_v56 = vadd.f32 %v520_v46, %v1830_v53  ;;  %v1841_v53 = vld [vmem:[#allocation43_spill] sm:$0xff] }
 0x294   :  { %v551_v8 = vadd.f32 %v519_v41, %v1829_v63 }
 0x296   :  { %724 = vmatmul.mubr.f32.gmra.mxu0 %v1184_v43 }
 0x297   :  { %729 = vmatprep.mubr.f32.mxu0 %v1789_v17 }
 0x29a   :  { %730 = vmatmul.mubr.f32.gmra.mxu0 %v1825_v33  ;;  %v1836_v33 = vld [vmem:[#allocation38_spill] sm:$0xff] }
 0x29b   :  { %735 = vmatprep.mubr.f32.mxu0 %v1789_v17 }
 0x29e   :  { %736 = vmatmul.mubr.f32.gmra.mxu0 %v1826_v34  ;;  %v558_v34 = vadd.f32 %v526_v32, %v1836_v33 }
 0x322   :  { %v647_v38 = vpop.f32.mrf.mxu0 }
 0x323   :  { %v744_v42 = vmul.f32 %v1658_v36, %v647_v38 }
 0x324   :  { %v649_v43 = vpop.f32.mrf.mxu0 }
 0x325   :  { %v776_v47 = vadd.f32 %v744_v42, %v549_v40  ;;  %v745_v48 = vmul.f32 %v1658_v36, %v649_v43  ;;  %v1837_v40 = vld [vmem:[#allocation40_spill] sm:$0xff] }
 0x326   :  { %v653_v50 = vpop.f32.mrf.mxu0 }
 0x327   :  { %808 = vst [vmem:[#allocation9] sm:$0xff] %v776_v47  ;;  %v777_v17 = vadd.f32 %v745_v48, %v550_v45  ;;  %v746_v0 = vmul.f32 %v1658_v36, %v653_v50  ;;  %v1839_v48 = vld [vmem:[#allocation15_spill] sm:$0xff] }
 0x328   :  { %v655_v1 = vpop.f32.mrf.mxu0 }
 0x329   :  { %809 = vst [vmem:[#allocation9 + $0x8] sm:$0xff] %v777_v17  ;;  %v778_v54 = vadd.f32 %v746_v0, %v551_v8  ;;  %v747_v29 = vmul.f32 %v1658_v36, %v655_v1 }
 0x32a   :  { %v659_v23 = vpop.f32.mrf.mxu0 }
 0x32b   :  { %810 = vst [vmem:[#allocation9 + $0x10] sm:$0xff] %v778_v54  ;;  %v779_v25 = vadd.f32 %v747_v29, %v552_v56  ;;  %v748_v21 = vmul.f32 %v1658_v36, %v659_v23  ;;  %v1842_v29 = vld [vmem:[#allocation44_spill] sm:$0xff] }
 0x32c   :  { %v661_v2 = vpop.f32.mrf.mxu0 }
 0x32d   :  { %811 = vst [vmem:[#allocation9 + $0x18] sm:$0xff] %v779_v25  ;;  %v780_v20 = vadd.f32 %v748_v21, %v553_v58  ;;  %v749_v10 = vmul.f32 %v1658_v36, %v661_v2 }
 0x32e   :  { %v665_v13 = vpop.f32.mrf.mxu0 }
 0x32f   :  { %812 = vst [vmem:[#allocation9 + $0x20] sm:$0xff] %v780_v20  ;;  %v781_v18 = vadd.f32 %v749_v10, %v554_v57  ;;  %v750_v59 = vmul.f32 %v1658_v36, %v665_v13  ;;  %v1845_v10 = vld [vmem:[#allocation23_spill] sm:$0xff] }
 0x330   :  { %v667_v12 = vpop.f32.mrf.mxu0 }
 0x331   :  { %813 = vst [vmem:[#allocation9 + $0x28] sm:$0xff] %v781_v18  ;;  %v782_v31 = vadd.f32 %v750_v59, %v555_v7  ;;  %v751_v6 = vmul.f32 %v1658_v36, %v667_v12 }
 0x332   :  { %v671_v19 = vpop.f32.mrf.mxu0 }
 0x333   :  { %814 = vst [vmem:[#allocation9 + $0x30] sm:$0xff] %v782_v31  ;;  %v783_v3 = vadd.f32 %v751_v6, %v556_v24  ;;  %v752_v51 = vmul.f32 %v1658_v36, %v671_v19  ;;  %v1848_v6 = vld [vmem:[#allocation29_spill] sm:$0xff] }
 0x334   :  { %v673_v11 = vpop.f32.mrf.mxu0 }
 0x335   :  { %815 = vst [vmem:[#allocation9 + $0x38] sm:$0xff] %v783_v3  ;;  %v784_v35 = vadd.f32 %v752_v51, %v557_v9  ;;  %v753_v37 = vmul.f32 %v1658_v36, %v673_v11  ;;  %v1849_v3 = vld [vmem:[#allocation31_spill] sm:$0xff] }
 0x336   :  { %v677_v38 = vpop.f32.mrf.mxu0 }
 0x337   :  { %816 = vst [vmem:[#allocation9 + $0x40] sm:$0xff] %v784_v35  ;;  %v785_v52 = vadd.f32 %v753_v37, %v558_v34  ;;  %v754_v55 = vmul.f32 %v1658_v36, %v677_v38  ;;  %v1850_v34 = vld [vmem:[#allocation33_spill] sm:$0xff] }
 0x338   :  { %v679_v39 = vpop.f32.mrf.mxu0 }
 0x339   :  { %817 = vst [vmem:[#allocation9 + $0x48] sm:$0xff] %v785_v52  ;;  %v786_v41 = vadd.f32 %v754_v55, %v1837_v40  ;;  %v755_v42 = vmul.f32 %v1658_v36, %v679_v39  ;;  %v1851_v52 = vld [vmem:[#allocation35_spill] sm:$0xff] }
 0x33a   :  { %v683_v43 = vpop.f32.mrf.mxu0 }
 0x33b   :  { %818 = vst [vmem:[#allocation9 + $0x50] sm:$0xff] %v786_v41  ;;  %v787_v45 = vadd.f32 %v755_v42, %v1838_v44  ;;  %v756_v46 = vmul.f32 %v1658_v36, %v683_v43  ;;  %v1852_v41 = vld [vmem:[#allocation37_spill] sm:$0xff] }
 0x33c   :  { %v685_v47 = vpop.f32.mrf.mxu0 }
 0x33d   :  { %819 = vst [vmem:[#allocation9 + $0x58] sm:$0xff] %v787_v45  ;;  %v788_v50 = vadd.f32 %v756_v46, %v1839_v48  ;;  %v757_v63 = vmul.f32 %v1658_v36, %v685_v47  ;;  %v1853_v45 = vld [vmem:[#allocation39_spill] sm:$0xff] }
 0x33e   :  { %v689_v8 = vpop.f32.mrf.mxu0 }
 0x33f   :  { %820 = vst [vmem:[#allocation9 + $0x60] sm:$0xff] %v788_v50  ;;  %v789_v17 = vadd.f32 %v757_v63, %v1840_v27  ;;  %v758_v0 = vmul.f32 %v1658_v36, %v689_v8  ;;  %v1854_v50 = vld [vmem:[#allocation41_spill] sm:$0xff] }
 0x340   :  { %v691_v1 = vpop.f32.mrf.mxu0 }
 0x341   :  { %821 = vst [vmem:[#allocation9 + $0x68] sm:$0xff] %v789_v17  ;;  %v790_v56 = vadd.f32 %v758_v0, %v1841_v53  ;;  %v759_v60 = vmul.f32 %v1658_v36, %v691_v1 }
 0x342   :  { %v695_v54 = vpop.f32.mrf.mxu0 }
 0x343   :  { %822 = vst [vmem:[#allocation9 + $0x70] sm:$0xff] %v790_v56  ;;  %v791_v23 = vadd.f32 %v759_v60, %v1842_v29  ;;  %v760_v4 = vmul.f32 %v1658_v36, %v695_v54 }
 0x344   :  { %v697_v58 = vpop.f32.mrf.mxu0 }
 0x345   :  { %823 = vst [vmem:[#allocation9 + $0x78] sm:$0xff] %v791_v23  ;;  %v792_v25 = vadd.f32 %v760_v4, %v1843_v61  ;;  %v761_v21 = vmul.f32 %v1658_v36, %v697_v58 }
 0x346   :  { %v701_v2 = vpop.f32.mrf.mxu0 }
 0x347   :  { %824 = vst [vmem:[#allocation9 + $0x80] sm:$0xff] %v792_v25  ;;  %v793_v57 = vadd.f32 %v761_v21, %v1844_v14  ;;  %v762_v62 = vmul.f32 %v1658_v36, %v701_v2 }
 0x348   :  { %v703_v20 = vpop.f32.mrf.mxu0 }
 0x349   :  { %825 = vst [vmem:[#allocation9 + $0x88] sm:$0xff] %v793_v57  ;;  %v794_v13 = vadd.f32 %v762_v62, %v1845_v10  ;;  %v763_v22 = vmul.f32 %v1658_v36, %v703_v20 }
 0x34a   :  { %v707_v7 = vpop.f32.mrf.mxu0 }
 0x34b   :  { %826 = vst [vmem:[#allocation9 + $0x90] sm:$0xff] %v794_v13  ;;  %v795_v18 = vadd.f32 %v763_v22, %v1846_v16  ;;  %v764_v59 = vmul.f32 %v1658_v36, %v707_v7 }
 0x34c   :  { %v709_v12 = vpop.f32.mrf.mxu0 }
 0x34d   :  { %827 = vst [vmem:[#allocation9 + $0x98] sm:$0xff] %v795_v18  ;;  %v796_v24 = vadd.f32 %v764_v59, %v1847_v26  ;;  %v765_v32 = vmul.f32 %v1658_v36, %v709_v12 }
 0x34e   :  { %v713_v31 = vpop.f32.mrf.mxu0 }
 0x34f   :  { %828 = vst [vmem:[#allocation9 + $0xa0] sm:$0xff] %v796_v24  ;;  %v797_v19 = vadd.f32 %v765_v32, %v1848_v6  ;;  %v766_v5 = vmul.f32 %v1658_v36, %v713_v31 }
 0x350   :  { %v715_v9 = vpop.f32.mrf.mxu0 }
 0x351   :  { %829 = vst [vmem:[#allocation9 + $0xa8] sm:$0xff] %v797_v19  ;;  %v798_v51 = vadd.f32 %v766_v5, %v1849_v3  ;;  %v767_v11 = vmul.f32 %v1658_v36, %v715_v9 }
 0x352   :  { %v719_v33 = vpop.f32.mrf.mxu0 }
 0x353   :  { %830 = vst [vmem:[#allocation9 + $0xb0] sm:$0xff] %v798_v51  ;;  %v799_v35 = vadd.f32 %v767_v11, %v1850_v34  ;;  %v768_v37 = vmul.f32 %v1658_v36, %v719_v33 }
 0x354   :  { %v721_v38 = vpop.f32.mrf.mxu0 }
 0x355   :  { %831 = vst [vmem:[#allocation9 + $0xb8] sm:$0xff] %v799_v35  ;;  %v800_v55 = vadd.f32 %v768_v37, %v1851_v52  ;;  %v769_v39 = vmul.f32 %v1658_v36, %v721_v38 }
 0x356   :  { %v725_v40 = vpop.f32.mrf.mxu0 }
 0x357   :  { %832 = vst [vmem:[#allocation9 + $0xc0] sm:$0xff] %v800_v55  ;;  %v801_v42 = vadd.f32 %v769_v39, %v1852_v41  ;;  %v770_v43 = vmul.f32 %v1658_v36, %v725_v40 }
 0x358   :  { %v727_v44 = vpop.f32.mrf.mxu0 }
 0x359   :  { %833 = vst [vmem:[#allocation9 + $0xc8] sm:$0xff] %v801_v42  ;;  %v802_v46 = vadd.f32 %v770_v43, %v1853_v45  ;;  %v771_v47 = vmul.f32 %v1658_v36, %v727_v44 }
 0x35a   :  { %v731_v48 = vpop.f32.mrf.mxu0 }
 0x35b   :  { %834 = vst [vmem:[#allocation9 + $0xd0] sm:$0xff] %v802_v46  ;;  %v803_v63 = vadd.f32 %v771_v47, %v1854_v50  ;;  %v772_v8 = vmul.f32 %v1658_v36, %v731_v48 }
 0x35c   :  { %v733_v27 = vpop.f32.mrf.mxu0 }
 0x35d   :  { %835 = vst [vmem:[#allocation9 + $0xd8] sm:$0xff] %v803_v63  ;;  %v804_v17 = vadd.f32 %v772_v8, %v1595_v15  ;;  %v773_v0 = vmul.f32 %v1658_v36, %v733_v27 }
 0x35e   :  { %v737_v1 = vpop.f32.mrf.mxu0 }
 0x35f   :  { %836 = vst [vmem:[#allocation9 + $0xe0] sm:$0xff] %v804_v17  ;;  %v805_v53 = vadd.f32 %v773_v0, %v1599_v30  ;;  %v774_v56 = vmul.f32 %v1658_v36, %v737_v1 }
 0x360   :  { %v739_v60 = vpop.f32.mrf.mxu0 }
 0x361   :  { %837 = vst [vmem:[#allocation9 + $0xe8] sm:$0xff] %v805_v53  ;;  %v806_v54 = vadd.f32 %v774_v56, %v1603_v28  ;;  %v775_v29 = vmul.f32 %v1658_v36, %v739_v60 }
 0x363   :  { %838 = vst [vmem:[#allocation9 + $0xf0] sm:$0xff] %v806_v54  ;;  %v807_v23 = vadd.f32 %v775_v29, %v1606_v49 }
 0x365   :  { %839 = vst [vmem:[#allocation9 + $0xf8] sm:$0xff] %v807_v23 }
 0x366   :  { %961 = shalt.err (!%p958_p0)
}
 0x367   :  { %851 = dma.vmem_to_hbm [thread:$0]  %s846_s4, 4096, %s1751_s3, [#allocation6], %s983_s24, %s983_s24, %s984_s25  }
 0x368   :  { %976 = dma.done.wait [#allocation6], 4096  }
 0x369   :  { %977 = vsyncadd [#allocation6], 4294963200 }
 0x36a   :  { %855 = vsyncpa [#allocation5], 1 }
 0x36b   :  { %856 = vsyncpa [#allocation8], 1 }
 0x36c   :  { %857 = vsyncpa [#allocation6], 1 }

// kernel: tpu_custom_call.1
= control target key start
LH: loop header
LB: loop body
LE: loop exit
PB: predicated region body
PF: predicated region fallthrough
CT: control target
= control target key end

     0   :  { %s978_s12 = smov [#allocation3]   ;;  %s1748_s0 = inlined_call_operand.hbm [shape: f32[4], index: 0, kind: input, shape index: {}]   ;;  %s1749_s1 = inlined_call_operand.hbm [shape: f32[128,128], index: 1, kind: input, shape index: {}]   ;;  %s1750_s2 = inlined_call_operand.hbm [shape: f32[128,256], index: 2, kind: input, shape index: {}]   ;;  %s1751_s3 = inlined_call_operand.hbm [shape: f32[128,256], index: 3, kind: output, shape index: {}]  }
   0x1   :  { %9 = dma.hbm_to_smem %s1748_s0, 16, %s978_s12, [#allocation2] }
   0x2   :  { %970 = dma.done.wait [#allocation2], 16 }
   0x3   :  { %971 = vsyncadd [#allocation2], 4294967280 }
   0x4   :  { %11 = sfence }
   0x5   :  { %12 = vsyncpa [#allocation5], 0 }
   0x6   :  { %13 = vsyncpa [#allocation8], 0 }
   0x7   :  { %14 = vsyncpa [#allocation6], 0  ;;  %s979_s15 = smov [#allocation4]  }
   0x8   :  { %s20_s16 = sshll.u32 %s979_s15, 4  ;;  %s21_s16 = int_to_ptr.vmem [resolvable:$true] %s20_s16 }
   0x9   :  { %s918_s17 = scalar_lea.vmem %s21_s16, 2048  ;;  %p923_p1 = scmp.lt.s32.totalorder %s21_s16, %s21_s16 }
   0xa   :  { %p919_p0 = scmp.ne.s32.totalorder %s21_s16, %s918_s17  ;;  %p924_p2 = scmp.lt.s32.totalorder %s918_s17, %s918_s17 }
   0xc   :  { %p925_p3 = por %p924_p2, %p923_p1 }
   0xe   :  { %p926_p4 = pnand %p925_p3, %p919_p0 }
  0x10   :  { %929 = shalt.err (!%p926_p4)
}
  0x11   :  { %s980_s18 = smov 128   ;;  %s981_s19 = smov 8  }
  0x12   :  { %26 = dma.hbm_to_vmem [thread:$0]  %s1749_s1, 2048, %s21_s16, [#allocation5], %s980_s18, %s980_s18, %s981_s19  }
  0x13   :  { %s982_s21 = smov [#allocation7]  }
  0x14   :  { %s32_s22 = sshll.u32 %s982_s21, 4  ;;  %s33_s22 = int_to_ptr.vmem [resolvable:$true] %s32_s22 }
  0x15   :  { %s938_s23 = scalar_lea.vmem %s33_s22, 4096  ;;  %p943_p6 = scmp.lt.s32.totalorder %s33_s22, %s33_s22 }
  0x16   :  { %p939_p5 = scmp.ne.s32.totalorder %s33_s22, %s938_s23  ;;  %p944_p7 = scmp.lt.s32.totalorder %s938_s23, %s938_s23 }
  0x18   :  { %p945_p8 = por %p944_p7, %p943_p6 }
  0x1a   :  { %p946_p9 = pnand %p945_p8, %p939_p5 }
  0x1c   :  { %949 = shalt.err (!%p946_p9)
}
  0x1d   :  { %s983_s24 = smov 256   ;;  %s984_s25 = smov 16  }
  0x1e   :  { %38 = dma.hbm_to_vmem [thread:$0]  %s1750_s2, 4096, %s33_s22, [#allocation8], %s983_s24, %s983_s24, %s984_s25  }
  0x1f   :  { %972 = dma.done.wait [#allocation5], 2048  }
  0x20   :  { %973 = vsyncadd [#allocation5], 4294965248 }
  0x21   :  { %974 = dma.done.wait [#allocation8], 4096  }
  0x22   :  { %975 = vsyncadd [#allocation8], 4294963200  ;;  %v1752_v0 = vmov 0.0   ;;  %v1021_v1 = vld [vmem:[#allocation7 + $0xf8] sm:$0xff]  ;;  %v1023_v2 = vld [vmem:[#allocation7 + $0xf0] sm:$0xff]  ;;  %s93_s1 = sld [smem:[#allocation3]] }
  0x23   :  { %239 = vmatprep.mubr.f32.mxu1 %v1752_v0  ;;  %191 = vmatprep.mubr.f32.mxu0 %v1752_v0  ;;  %1760 = vst [vmem:[#allocation14_spill] sm:$0xff] %v1021_v1  ;;  %v1025_v3 = vld [vmem:[#allocation7 + $0xe8] sm:$0xff]  ;;  %v1028_v4 = vld [vmem:[#allocation7 + $0xe0] sm:$0xff]  ;;  %v1032_v5 = vld [vmem:[#allocation7 + $0xd8] sm:$0xff]  ;;  %s858_s2 = sld [smem:[#allocation3 + $0x1]]  ;;  %s986_s30 = smov [#allocation9]  }
  0x24   :  { %861 = vmatprep.subr.mxu1 %v1021_v1  ;;  %127 = vmatprep.subr.mxu0 %v1021_v1  ;;  %v1036_v6 = vld [vmem:[#allocation7 + $0xd0] sm:$0xff]  ;;  %v1040_v7 = vld [vmem:[#allocation7 + $0xc8] sm:$0xff]  ;;  %v1044_v8 = vld [vmem:[#allocation7 + $0xc0] sm:$0xff]  ;;  %s859_s28 = sld [smem:[#allocation3 + $0x2]]  ;;  %s845_s4 = sshll.u32 %s986_s30, 4  ;;  %s846_s4 = int_to_ptr.vmem [resolvable:$true] %s845_s4 }
  0x25   :  { %877 = vmatpush1.msra.mxu1 %v1023_v2  ;;  %128 = vmatpush1.msra.mxu0 %v1023_v2  ;;  %v1048_v9 = vld [vmem:[#allocation7 + $0xb8] sm:$0xff]  ;;  %v1052_v10 = vld [vmem:[#allocation7 + $0xb0] sm:$0xff]  ;;  %v1056_v11 = vld [vmem:[#allocation7 + $0xa8] sm:$0xff]  ;;  %s860_s29 = sld [smem:[#allocation3 + $0x3]]  ;;  %s950_s5 = scalar_lea.vmem %s846_s4, 4096 }
  0x26   :  { %862 = vmatprep.subr.mxu1 %v1025_v3  ;;  %129 = vmatprep.subr.mxu0 %v1025_v3  ;;  %v1060_v12 = vld [vmem:[#allocation7 + $0xa0] sm:$0xff]  ;;  %v1064_v13 = vld [vmem:[#allocation7 + $0x98] sm:$0xff]  ;;  %v1068_v14 = vld [vmem:[#allocation7 + $0x90] sm:$0xff]  ;;  %p951_p10 = scmp.ne.s32.totalorder %s846_s4, %s950_s5  ;;  %p955_p11 = scmp.lt.s32.totalorder %s846_s4, %s846_s4 }
  0x27   :  { %878 = vmatpush1.msra.mxu1 %v1028_v4  ;;  %130 = vmatpush1.msra.mxu0 %v1028_v4  ;;  %v1072_v15 = vld [vmem:[#allocation7 + $0x88] sm:$0xff]  ;;  %v1076_v16 = vld [vmem:[#allocation7 + $0x80] sm:$0xff]  ;;  %v1080_v17 = vld [vmem:[#allocation7 + $0x78] sm:$0xff]  ;;  %p956_p12 = scmp.lt.s32.totalorder %s950_s5, %s950_s5 }
  0x28   :  { %863 = vmatprep.subr.mxu1 %v1032_v5  ;;  %131 = vmatprep.subr.mxu0 %v1032_v5  ;;  %1761 = vst [vmem:[#allocation15_spill] sm:$0xff] %v1080_v17  ;;  %v1084_v18 = vld [vmem:[#allocation7 + $0x70] sm:$0xff]  ;;  %v1088_v19 = vld [vmem:[#allocation7 + $0x68] sm:$0xff]  ;;  %v1092_v20 = vld [vmem:[#allocation7 + $0x60] sm:$0xff]  ;;  %v1209_v49 = vstv %s93_s1 }
  0x29   :  { %879 = vmatpush1.msra.mxu1 %v1036_v6  ;;  %132 = vmatpush1.msra.mxu0 %v1036_v6  ;;  %v1096_v21 = vld [vmem:[#allocation7 + $0x58] sm:$0xff]  ;;  %v1100_v22 = vld [vmem:[#allocation7 + $0x50] sm:$0xff]  ;;  %v1104_v23 = vld [vmem:[#allocation7 + $0x48] sm:$0xff]  ;;  %1764 = vst [vmem:[#allocation18_spill] sm:$0xff] %v1209_v49  ;;  %v1211_v50 = vstv %s858_s2  ;;  %v111_v51 = vmul.f32 %v1209_v49, %v1076_v16  ;;  %v112_v55 = vmul.f32 %v1209_v49, %v1072_v15  ;;  %p957_p13 = por %p956_p12, %p955_p11 }
  0x2a   :  { %864 = vmatprep.subr.mxu1 %v1040_v7  ;;  %133 = vmatprep.subr.mxu0 %v1040_v7  ;;  %v1108_v24 = vld [vmem:[#allocation7 + $0x40] sm:$0xff]  ;;  %v1112_v25 = vld [vmem:[#allocation7 + $0x38] sm:$0xff]  ;;  %v1116_v26 = vld [vmem:[#allocation7 + $0x30] sm:$0xff]  ;;  %v113_v59 = vmul.f32 %v1209_v49, %v1068_v14 }
  0x2b   :  { %880 = vmatpush1.msra.mxu1 %v1044_v8  ;;  %134 = vmatpush1.msra.mxu0 %v1044_v8  ;;  %v1120_v27 = vld [vmem:[#allocation7 + $0x28] sm:$0xff]  ;;  %v1124_v28 = vld [vmem:[#allocation7 + $0x20] sm:$0xff]  ;;  %v1128_v29 = vld [vmem:[#allocation7 + $0x18] sm:$0xff]  ;;  %p958_p0 = pnand %p957_p13, %p951_p10 }
  0x2c   :  { %865 = vmatprep.subr.mxu1 %v1048_v9  ;;  %135 = vmatprep.subr.mxu0 %v1048_v9  ;;  %v1132_v30 = vld [vmem:[#allocation7 + $0x10] sm:$0xff]  ;;  %v1136_v31 = vld [vmem:[#allocation7 + $0x8] sm:$0xff]  ;;  %v61_v32 = vld [vmem:[#allocation7] sm:$0xff] }
  0x2d   :  { %881 = vmatpush1.msra.mxu1 %v1052_v10  ;;  %136 = vmatpush1.msra.mxu0 %v1052_v10  ;;  %v1142_v33 = vld [vmem:[#allocation4 + $0x40] sm:$0xff]  ;;  %v1152_v35 = vld [vmem:[#allocation4 + $0x48] sm:$0xff]  ;;  %v1160_v37 = vld [vmem:[#allocation4 + $0x50] sm:$0xff]  ;;  %v95_v52 = vmul.f32 %v1209_v49, %v61_v32  ;;  %v96_v56 = vmul.f32 %v1209_v49, %v1136_v31  ;;  %v97_v60 = vmul.f32 %v1209_v49, %v1132_v30 }
  0x2e   :  { %866 = vmatprep.subr.mxu1 %v1056_v11  ;;  %137 = vmatprep.subr.mxu0 %v1056_v11  ;;  %v1145_v34 = vld [vmem:[#allocation4] sm:$0xff]  ;;  %v1155_v36 = vld [vmem:[#allocation4 + $0x8] sm:$0xff]  ;;  %v1163_v38 = vld [vmem:[#allocation4 + $0x10] sm:$0xff] }
  0x2f   :  { %882 = vmatpush1.msra.mxu1 %v1060_v12  ;;  %138 = vmatpush1.msra.mxu0 %v1060_v12  ;;  %v1168_v39 = vld [vmem:[#allocation4 + $0x58] sm:$0xff]  ;;  %v1176_v41 = vld [vmem:[#allocation4 + $0x60] sm:$0xff]  ;;  %v1184_v43 = vld [vmem:[#allocation4 + $0x68] sm:$0xff] }
  0x30   :  { %867 = vmatprep.subr.mxu1 %v1064_v13  ;;  %139 = vmatprep.subr.mxu0 %v1064_v13  ;;  %v1171_v40 = vld [vmem:[#allocation4 + $0x18] sm:$0xff]  ;;  %v1179_v42 = vld [vmem:[#allocation4 + $0x20] sm:$0xff]  ;;  %v1187_v44 = vld [vmem:[#allocation4 + $0x28] sm:$0xff] }
  0x31   :  { %883 = vmatpush1.msra.mxu1 %v1068_v14  ;;  %140 = vmatpush1.msra.mxu0 %v1068_v14  ;;  %v1192_v45 = vld [vmem:[#allocation4 + $0x70] sm:$0xff]  ;;  %v1200_v47 = vld [vmem:[#allocation4 + $0x78] sm:$0xff]  ;;  %v114_v14 = vmul.f32 %v1209_v49, %v1064_v13  ;;  %v115_v13 = vmul.f32 %v1209_v49, %v1060_v12  ;;  %v116_v12 = vmul.f32 %v1209_v49, %v1056_v11 }
  0x32   :  { %868 = vmatprep.subr.mxu1 %v1072_v15  ;;  %141 = vmatprep.subr.mxu0 %v1072_v15  ;;  %1762 = vst [vmem:[#allocation16_spill] sm:$0xff] %v1192_v45  ;;  %v1195_v46 = vld [vmem:[#allocation4 + $0x30] sm:$0xff]  ;;  %1763 = vst [vmem:[#allocation17_spill] sm:$0xff] %v1200_v47  ;;  %v1203_v48 = vld [vmem:[#allocation4 + $0x38] sm:$0xff]  ;;  %v117_v11 = vmul.f32 %v1209_v49, %v1052_v10  ;;  %v118_v10 = vmul.f32 %v1209_v49, %v1048_v9 }
  0x33   :  { %884 = vmatpush1.msra.mxu1 %v1076_v16  ;;  %142 = vmatpush1.msra.mxu0 %v1076_v16  ;;  %v119_v9 = vmul.f32 %v1209_v49, %v1044_v8  ;;  %v120_v8 = vmul.f32 %v1209_v49, %v1040_v7  ;;  %v105_v7 = vmul.f32 %v1209_v49, %v1100_v22 }
  0x34   :  { %869 = vmatprep.subr.mxu1 %v1080_v17  ;;  %143 = vmatprep.subr.mxu0 %v1080_v17 }
  0x35   :  { %885 = vmatpush1.msra.mxu1 %v1084_v18  ;;  %144 = vmatpush1.msra.mxu0 %v1084_v18 }
  0x36   :  { %870 = vmatprep.subr.mxu1 %v1088_v19  ;;  %145 = vmatprep.subr.mxu0 %v1088_v19 }
  0x37   :  { %886 = vmatpush1.msra.mxu1 %v1092_v20  ;;  %146 = vmatpush1.msra.mxu0 %v1092_v20 }
  0x38   :  { %871 = vmatprep.subr.mxu1 %v1096_v21  ;;  %147 = vmatprep.subr.mxu0 %v1096_v21 }
  0x39   :  { %887 = vmatpush1.msra.mxu1 %v1100_v22  ;;  %148 = vmatpush1.msra.mxu0 %v1100_v22 }
  0x3a   :  { %872 = vmatprep.subr.mxu1 %v1104_v23  ;;  %149 = vmatprep.subr.mxu0 %v1104_v23 }
  0x3b   :  { %888 = vmatpush1.msra.mxu1 %v1108_v24  ;;  %150 = vmatpush1.msra.mxu0 %v1108_v24 }
  0x3c   :  { %873 = vmatprep.subr.mxu1 %v1112_v25  ;;  %151 = vmatprep.subr.mxu0 %v1112_v25 }
  0x3d   :  { %889 = vmatpush1.msra.mxu1 %v1116_v26  ;;  %152 = vmatpush1.msra.mxu0 %v1116_v26 }
  0x3e   :  { %874 = vmatprep.subr.mxu1 %v1120_v27  ;;  %153 = vmatprep.subr.mxu0 %v1120_v27 }
  0x3f   :  { %890 = vmatpush1.msra.mxu1 %v1124_v28  ;;  %154 = vmatpush1.msra.mxu0 %v1124_v28 }
  0x40   :  { %875 = vmatprep.subr.mxu1 %v1128_v29  ;;  %155 = vmatprep.subr.mxu0 %v1128_v29 }
  0x41   :  { %891 = vmatpush1.msra.mxu1 %v1132_v30  ;;  %156 = vmatpush1.msra.mxu0 %v1132_v30  ;;  %v98_v30 = vmul.f32 %v1209_v49, %v1128_v29  ;;  %v99_v29 = vmul.f32 %v1209_v49, %v1124_v28  ;;  %v100_v28 = vmul.f32 %v1209_v49, %v1120_v27 }
  0x42   :  { %876 = vmatprep.subr.mxu1 %v1136_v31  ;;  %157 = vmatprep.subr.mxu0 %v1136_v31  ;;  %v101_v27 = vmul.f32 %v1209_v49, %v1116_v26  ;;  %v102_v26 = vmul.f32 %v1209_v49, %v1112_v25  ;;  %v103_v25 = vmul.f32 %v1209_v49, %v1108_v24 }
  0x43   :  { %892 = vmatpush1.msra.mxu1 %v61_v32  ;;  %158 = vmatpush1.msra.mxu0 %v61_v32  ;;  %v104_v24 = vmul.f32 %v1209_v49, %v1104_v23 }
  0x44   :  { %240 = vmatmul.mubr.f32.vlgmr.msra.gmra.mxu1 %v1142_v33  ;;  %192 = vmatmul.mubr.f32.vlgmr.msra.gmra.mxu0 %v1145_v34 }
  0x45   :  { %245 = vmatprep.mubr.f32.mxu1 %v1752_v0  ;;  %197 = vmatprep.mubr.f32.mxu0 %v1752_v0 }
  0x48   :  { %246 = vmatmul.mubr.f32.gmra.mxu1 %v1152_v35  ;;  %198 = vmatmul.mubr.f32.gmra.mxu0 %v1155_v36 }
  0x49   :  { %251 = vmatprep.mubr.f32.mxu1 %v1752_v0  ;;  %203 = vmatprep.mubr.f32.mxu0 %v1752_v0 }
  0x4c   :  { %252 = vmatmul.mubr.f32.gmra.mxu1 %v1160_v37  ;;  %204 = vmatmul.mubr.f32.gmra.mxu0 %v1163_v38 }
  0x4d   :  { %257 = vmatprep.mubr.f32.mxu1 %v1752_v0  ;;  %209 = vmatprep.mubr.f32.mxu0 %v1752_v0 }
  0x50   :  { %258 = vmatmul.mubr.f32.gmra.mxu1 %v1168_v39  ;;  %210 = vmatmul.mubr.f32.gmra.mxu0 %v1171_v40 }
  0x51   :  { %263 = vmatprep.mubr.f32.mxu1 %v1752_v0  ;;  %215 = vmatprep.mubr.f32.mxu0 %v1752_v0 }
  0x54   :  { %264 = vmatmul.mubr.f32.gmra.mxu1 %v1176_v41  ;;  %216 = vmatmul.mubr.f32.gmra.mxu0 %v1179_v42 }
  0x55   :  { %269 = vmatprep.mubr.f32.mxu1 %v1752_v0  ;;  %221 = vmatprep.mubr.f32.mxu0 %v1752_v0 }
  0x58   :  { %270 = vmatmul.mubr.f32.gmra.mxu1 %v1184_v43  ;;  %222 = vmatmul.mubr.f32.gmra.mxu0 %v1187_v44 }
  0x59   :  { %275 = vmatprep.mubr.f32.mxu1 %v1752_v0  ;;  %227 = vmatprep.mubr.f32.mxu0 %v1752_v0 }
  0x5c   :  { %276 = vmatmul.mubr.f32.gmra.mxu1 %v1192_v45  ;;  %228 = vmatmul.mubr.f32.gmra.mxu0 %v1195_v46 }
  0x5d   :  { %281 = vmatprep.mubr.f32.mxu1 %v1752_v0  ;;  %233 = vmatprep.mubr.f32.mxu0 %v1752_v0 }
  0x60   :  { %282 = vmatmul.mubr.f32.gmra.mxu1 %v1200_v47  ;;  %234 = vmatmul.mubr.f32.gmra.mxu0 %v1203_v48 }
  0x61   :  { %418 = vmatprep.mubr.f32.mxu1 %v1752_v0  ;;  %645 = vmatprep.mubr.f32.mxu0 %v1752_v0 }
 0x104   :  { %v1216_v53 = vpop.f32.mrf.mxu1  ;;  %v1218_v54 = vpop.f32.mrf.mxu0 }
 0x105   :  { %v306_v57 = vmul.f32 %v1211_v50, %v1216_v53  ;;  %v290_v58 = vmul.f32 %v1211_v50, %v1218_v54 }
 0x106   :  { %v1232_v61 = vpop.f32.mrf.mxu1  ;;  %v1234_v62 = vpop.f32.mrf.mxu0 }
 0x107   :  { %v1236_v63 = vadd.f32 %v306_v57, %v111_v51  ;;  %v307_v15 = vmul.f32 %v1211_v50, %v1232_v61  ;;  %v1240_v16 = vadd.f32 %v290_v58, %v95_v52  ;;  %v291_v31 = vmul.f32 %v1211_v50, %v1234_v62 }
 0x108   :  { %v1248_v32 = vpop.f32.mrf.mxu1  ;;  %v1250_v0 = vpop.f32.mrf.mxu0 }
 0x109   :  { %1765 = vst [vmem:[#allocation19_spill] sm:$0xff] %v1236_v63  ;;  %1766 = vst [vmem:[#allocation20_spill] sm:$0xff] %v1240_v16  ;;  %v1252_v51 = vadd.f32 %v307_v15, %v112_v55  ;;  %v308_v57 = vmul.f32 %v1211_v50, %v1248_v32  ;;  %v1256_v52 = vadd.f32 %v291_v31, %v96_v56 }
 0x10a   :  { %v292_v58 = vmul.f32 %v1211_v50, %v1250_v0  ;;  %v1264_v16 = vpop.f32.mrf.mxu1  ;;  %v1266_v1 = vpop.f32.mrf.mxu0 }
 0x10b   :  { %1767 = vst [vmem:[#allocation21_spill] sm:$0xff] %v1252_v51  ;;  %1768 = vst [vmem:[#allocation22_spill] sm:$0xff] %v1256_v52  ;;  %v1268_v55 = vadd.f32 %v308_v57, %v113_v59  ;;  %v309_v15 = vmul.f32 %v1211_v50, %v1264_v16  ;;  %v293_v31 = vmul.f32 %v1211_v50, %v1266_v1 }
 0x10c   :  { %v1272_v56 = vadd.f32 %v292_v58, %v97_v60  ;;  %v1280_v52 = vpop.f32.mrf.mxu1  ;;  %v1282_v51 = vpop.f32.mrf.mxu0 }
 0x10d   :  { %1769 = vst [vmem:[#allocation23_spill] sm:$0xff] %v1268_v55  ;;  %v1284_v59 = vadd.f32 %v309_v15, %v114_v14  ;;  %v310_v57 = vmul.f32 %v1211_v50, %v1280_v52  ;;  %v1288_v60 = vadd.f32 %v293_v31, %v98_v30  ;;  %v294_v58 = vmul.f32 %v1211_v50, %v1282_v51 }
 0x10e   :  { %1770 = vst [vmem:[#allocation24_spill] sm:$0xff] %v1272_v56  ;;  %v1296_v56 = vpop.f32.mrf.mxu1  ;;  %v1298_v55 = vpop.f32.mrf.mxu0 }
 0x10f   :  { %1771 = vst [vmem:[#allocation25_spill] sm:$0xff] %v1284_v59  ;;  %1772 = vst [vmem:[#allocation26_spill] sm:$0xff] %v1288_v60  ;;  %v1300_v14 = vadd.f32 %v310_v57, %v115_v13  ;;  %v311_v15 = vmul.f32 %v1211_v50, %v1296_v56  ;;  %v1304_v30 = vadd.f32 %v294_v58, %v99_v29 }
 0x110   :  { %v295_v31 = vmul.f32 %v1211_v50, %v1298_v55  ;;  %v1312_v60 = vpop.f32.mrf.mxu1  ;;  %v1314_v59 = vpop.f32.mrf.mxu0 }
 0x111   :  { %1773 = vst [vmem:[#allocation27_spill] sm:$0xff] %v1300_v14  ;;  %1774 = vst [vmem:[#allocation28_spill] sm:$0xff] %v1304_v30  ;;  %v1316_v13 = vadd.f32 %v311_v15, %v116_v12  ;;  %v312_v57 = vmul.f32 %v1211_v50, %v1312_v60  ;;  %v296_v58 = vmul.f32 %v1211_v50, %v1314_v59 }
 0x112   :  { %v1320_v29 = vadd.f32 %v295_v31, %v100_v28  ;;  %v1328_v30 = vpop.f32.mrf.mxu1  ;;  %v1330_v14 = vpop.f32.mrf.mxu0 }
 0x113   :  { %1775 = vst [vmem:[#allocation29_spill] sm:$0xff] %v1316_v13  ;;  %v1332_v12 = vadd.f32 %v312_v57, %v117_v11  ;;  %v313_v15 = vmul.f32 %v1211_v50, %v1328_v30  ;;  %v1336_v28 = vadd.f32 %v296_v58, %v101_v27  ;;  %v297_v31 = vmul.f32 %v1211_v50, %v1330_v14 }
 0x114   :  { %1776 = vst [vmem:[#allocation30_spill] sm:$0xff] %v1320_v29  ;;  %v265_v29 = vpop.f32.mrf.mxu1  ;;  %v1344_v13 = vpop.f32.mrf.mxu0  ;;  %v121_v58 = vmul.f32 %v1209_v49, %v1036_v6  ;;  %v106_v6 = vmul.f32 %v1209_v49, %v1096_v21 }
 0x115   :  { %1777 = vst [vmem:[#allocation31_spill] sm:$0xff] %v1332_v12  ;;  %1778 = vst [vmem:[#allocation32_spill] sm:$0xff] %v1336_v28  ;;  %v1346_v63 = vadd.f32 %v313_v15, %v118_v10  ;;  %v314_v11 = vmul.f32 %v1211_v50, %v265_v29  ;;  %v1349_v57 = vadd.f32 %v297_v31, %v102_v26 }
 0x116   :  { %v298_v27 = vmul.f32 %v1211_v50, %v1344_v13  ;;  %v267_v28 = vpop.f32.mrf.mxu1  ;;  %v1357_v23 = vpop.f32.mrf.mxu0  ;;  %v122_v31 = vmul.f32 %v1209_v49, %v1032_v5 }
 0x117   :  { %1779 = vst [vmem:[#allocation33_spill] sm:$0xff] %v1346_v63  ;;  %1780 = vst [vmem:[#allocation34_spill] sm:$0xff] %v1349_v57  ;;  %v1359_v12 = vadd.f32 %v314_v11, %v119_v9  ;;  %v315_v10 = vmul.f32 %v1211_v50, %v267_v28  ;;  %v299_v26 = vmul.f32 %v1211_v50, %v1357_v23 }
 0x118   :  { %v1362_v15 = vadd.f32 %v298_v27, %v103_v25  ;;  %v271_v57 = vpop.f32.mrf.mxu1  ;;  %v223_v22 = vpop.f32.mrf.mxu0  ;;  %v123_v27 = vmul.f32 %v1209_v49, %v1028_v4 }
 0x119   :  { %1781 = vst [vmem:[#allocation35_spill] sm:$0xff] %v1359_v12  ;;  %v1370_v63 = vadd.f32 %v315_v10, %v120_v8  ;;  %v316_v9 = vmul.f32 %v1211_v50, %v271_v57  ;;  %v1373_v11 = vadd.f32 %v299_v26, %v104_v24  ;;  %v300_v25 = vmul.f32 %v1211_v50, %v223_v22 }
 0x11a   :  { %1782 = vst [vmem:[#allocation36_spill] sm:$0xff] %v1362_v15  ;;  %v107_v15 = vmul.f32 %v1209_v49, %v1092_v20  ;;  %v273_v5 = vpop.f32.mrf.mxu1  ;;  %v225_v12 = vpop.f32.mrf.mxu0  ;;  %v124_v24 = vmul.f32 %v1209_v49, %v1025_v3  ;;  %v108_v26 = vmul.f32 %v1209_v49, %v1088_v19 }
 0x11b   :  { %1783 = vst [vmem:[#allocation37_spill] sm:$0xff] %v1370_v63  ;;  %1784 = vst [vmem:[#allocation38_spill] sm:$0xff] %v1373_v11  ;;  %v1380_v17 = vadd.f32 %v316_v9, %v121_v58  ;;  %v317_v21 = vmul.f32 %v1211_v50, %v273_v5  ;;  %v1383_v8 = vadd.f32 %v300_v25, %v105_v7 }
 0x11c   :  { %v301_v10 = vmul.f32 %v1211_v50, %v225_v12  ;;  %v277_v4 = vpop.f32.mrf.mxu1  ;;  %v229_v11 = vpop.f32.mrf.mxu0  ;;  %v125_v7 = vmul.f32 %v1209_v49, %v1023_v2  ;;  %v109_v25 = vmul.f32 %v1209_v49, %v1084_v18 }
 0x11d   :  { %1785 = vst [vmem:[#allocation39_spill] sm:$0xff] %v1380_v17  ;;  %1786 = vst [vmem:[#allocation40_spill] sm:$0xff] %v1383_v8  ;;  %v1390_v63 = vadd.f32 %v317_v21, %v122_v31  ;;  %v318_v20 = vmul.f32 %v1211_v50, %v277_v4  ;;  %v302_v9 = vmul.f32 %v1211_v50, %v229_v11 }
 0x11e   :  { %v1393_v58 = vadd.f32 %v301_v10, %v106_v6  ;;  %v279_v3 = vpop.f32.mrf.mxu1  ;;  %v231_v17 = vpop.f32.mrf.mxu0 }
 0x11f   :  { %1787 = vst [vmem:[#allocation41_spill] sm:$0xff] %v1390_v63  ;;  %v1400_v8 = vadd.f32 %v318_v20, %v123_v27  ;;  %v319_v19 = vmul.f32 %v1211_v50, %v279_v3  ;;  %v1403_v31 = vadd.f32 %v302_v9, %v107_v15  ;;  %v303_v21 = vmul.f32 %v1211_v50, %v231_v17 }
 0x120   :  { %1788 = vst [vmem:[#allocation42_spill] sm:$0xff] %v1393_v58  ;;  %v283_v6 = vpop.f32.mrf.mxu1  ;;  %v235_v10 = vpop.f32.mrf.mxu0 }
 0x121   :  { %v1406_v63 = vadd.f32 %v319_v19, %v124_v24  ;;  %v320_v58 = vmul.f32 %v1211_v50, %v283_v6  ;;  %v1409_v2 = vadd.f32 %v303_v21, %v108_v26  ;;  %v304_v18 = vmul.f32 %v1211_v50, %v235_v10 }
 0x122   :  { %v1412_v49 = vpop.f32.mrf.mxu1  ;;  %v1426_v24 = vpop.f32.mrf.mxu0 }
 0x123   :  { %v1414_v27 = vadd.f32 %v320_v58, %v125_v7  ;;  %354 = vmatprep.subr.mxu1 %v1412_v49  ;;  %v1417_v15 = vadd.f32 %v304_v18, %v109_v25  ;;  %v305_v26 = vmul.f32 %v1211_v50, %v1426_v24  ;;  %v1800_v18 = vld [vmem:[#allocation19_spill] sm:$0xff] }
 0x124   :  { %355 = vmatpush1.msra.mxu1 %v283_v6 }
 0x125   :  { %356 = vmatprep.subr.mxu1 %v279_v3 }
 0x126   :  { %357 = vmatpush1.msra.mxu1 %v277_v4 }
 0x127   :  { %358 = vmatprep.subr.mxu1 %v273_v5 }
 0x128   :  { %359 = vmatpush1.msra.mxu1 %v271_v57 }
 0x129   :  { %360 = vmatprep.subr.mxu1 %v267_v28 }
 0x12a   :  { %361 = vmatpush1.msra.mxu1 %v265_v29 }
 0x12b   :  { %362 = vmatprep.subr.mxu1 %v1328_v30 }
 0x12c   :  { %363 = vmatpush1.msra.mxu1 %v1312_v60 }
 0x12d   :  { %364 = vmatprep.subr.mxu1 %v1296_v56 }
 0x12e   :  { %365 = vmatpush1.msra.mxu1 %v1280_v52 }
 0x12f   :  { %366 = vmatprep.subr.mxu1 %v1264_v16 }
 0x130   :  { %367 = vmatpush1.msra.mxu1 %v1248_v32 }
 0x131   :  { %368 = vmatprep.subr.mxu1 %v1232_v61 }
 0x132   :  { %369 = vmatpush1.msra.mxu1 %v1216_v53 }
 0x133   :  { %370 = vmatprep.subr.mxu1 %v1426_v24 }
 0x134   :  { %371 = vmatpush1.msra.mxu1 %v235_v10 }
 0x135   :  { %372 = vmatprep.subr.mxu1 %v231_v17  ;;  %v1789_v17 = vmov 0.0  }
 0x136   :  { %373 = vmatpush1.msra.mxu1 %v229_v11  ;;  %v1795_v11 = vld [vmem:[#allocation18_spill] sm:$0xff] }
 0x137   :  { %374 = vmatprep.subr.mxu1 %v225_v12  ;;  %v1792_v12 = vld [vmem:[#allocation42_spill] sm:$0xff] }
 0x138   :  { %375 = vmatpush1.msra.mxu1 %v223_v22  ;;  %v1794_v22 = vld [vmem:[#allocation15_spill] sm:$0xff] }
 0x139   :  { %376 = vmatprep.subr.mxu1 %v1357_v23  ;;  %v110_v5 = vmul.f32 %v1795_v11, %v1794_v22  ;;  %v1804_v22 = vld [vmem:[#allocation23_spill] sm:$0xff] }
 0x13a   :  { %377 = vmatpush1.msra.mxu1 %v1344_v13 }
 0x13b   :  { %378 = vmatprep.subr.mxu1 %v1330_v14  ;;  %v1790_v14 = vld [vmem:[#allocation40_spill] sm:$0xff]  ;;  %v337_v3 = vadd.f32 %v305_v26, %v110_v5 }
 0x13c   :  { %379 = vmatpush1.msra.mxu1 %v1314_v59 }
 0x13d   :  { %380 = vmatprep.subr.mxu1 %v1298_v55  ;;  %v1491_v55 = vstv %s859_s28 }
 0x13e   :  { %381 = vmatpush1.msra.mxu1 %v1282_v51 }
 0x13f   :  { %382 = vmatprep.subr.mxu1 %v1266_v1 }
 0x140   :  { %383 = vmatpush1.msra.mxu1 %v1250_v0 }
 0x141   :  { %384 = vmatprep.subr.mxu1 %v1234_v62 }
 0x142   :  { %385 = vmatpush1.msra.mxu1 %v1218_v54 }
 0x143   :  { %419 = vmatmul.mubr.f32.vlgmr.msra.gmra.mxu1 %v1145_v34 }
 0x144   :  { %424 = vmatprep.mubr.f32.mxu1 %v1789_v17 }
 0x147   :  { %425 = vmatmul.mubr.f32.gmra.mxu1 %v1155_v36 }
 0x148   :  { %430 = vmatprep.mubr.f32.mxu1 %v1789_v17 }
 0x14b   :  { %431 = vmatmul.mubr.f32.gmra.mxu1 %v1163_v38 }
 0x14c   :  { %436 = vmatprep.mubr.f32.mxu1 %v1789_v17 }
 0x14f   :  { %437 = vmatmul.mubr.f32.gmra.mxu1 %v1171_v40 }
 0x150   :  { %442 = vmatprep.mubr.f32.mxu1 %v1789_v17 }
 0x153   :  { %443 = vmatmul.mubr.f32.gmra.mxu1 %v1179_v42 }
 0x154   :  { %448 = vmatprep.mubr.f32.mxu1 %v1789_v17 }
 0x157   :  { %449 = vmatmul.mubr.f32.gmra.mxu1 %v1187_v44 }
 0x158   :  { %454 = vmatprep.mubr.f32.mxu1 %v1789_v17 }
 0x15b   :  { %455 = vmatmul.mubr.f32.gmra.mxu1 %v1195_v46 }
 0x15c   :  { %460 = vmatprep.mubr.f32.mxu1 %v1789_v17 }
 0x15f   :  { %461 = vmatmul.mubr.f32.gmra.mxu1 %v1203_v48 }
 0x160   :  { %466 = vmatprep.mubr.f32.mxu1 %v1789_v17 }
 0x163   :  { %467 = vmatmul.mubr.f32.gmra.mxu1 %v1142_v33 }
 0x164   :  { %472 = vmatprep.mubr.f32.mxu1 %v1789_v17 }
 0x167   :  { %473 = vmatmul.mubr.f32.gmra.mxu1 %v1152_v35 }
 0x168   :  { %478 = vmatprep.mubr.f32.mxu1 %v1789_v17 }
 0x16b   :  { %479 = vmatmul.mubr.f32.gmra.mxu1 %v1160_v37 }
 0x16c   :  { %484 = vmatprep.mubr.f32.mxu1 %v1789_v17 }
 0x16f   :  { %485 = vmatmul.mubr.f32.gmra.mxu1 %v1168_v39 }
 0x170   :  { %490 = vmatprep.mubr.f32.mxu1 %v1789_v17 }
 0x173   :  { %491 = vmatmul.mubr.f32.gmra.mxu1 %v1176_v41 }
 0x174   :  { %496 = vmatprep.mubr.f32.mxu1 %v1789_v17 }
 0x177   :  { %497 = vmatmul.mubr.f32.gmra.mxu1 %v1184_v43 }
 0x178   :  { %502 = vmatprep.mubr.f32.mxu1 %v1789_v17 }
 0x17b   :  { %503 = vmatmul.mubr.f32.gmra.mxu1 %v1192_v45 }
 0x17c   :  { %508 = vmatprep.mubr.f32.mxu1 %v1789_v17 }
 0x17f   :  { %509 = vmatmul.mubr.f32.gmra.mxu1 %v1200_v47 }
 0x203   :  { %v1471_v0 = vpop.f32.mrf.mxu1 }
 0x205   :  { %v1473_v1 = vpop.f32.mrf.mxu1 }
 0x207   :  { %v1475_v53 = vpop.f32.mrf.mxu1 }
 0x209   :  { %v1477_v54 = vpop.f32.mrf.mxu1 }
 0x20b   :  { %v1479_v61 = vpop.f32.mrf.mxu1 }
 0x20d   :  { %v1481_v62 = vpop.f32.mrf.mxu1 }
 0x20f   :  { %v1483_v16 = vpop.f32.mrf.mxu1 }
 0x211   :  { %v1485_v32 = vpop.f32.mrf.mxu1 }
 0x213   :  { %v1487_v51 = vpop.f32.mrf.mxu1 }
 0x215   :  { %v1489_v52 = vpop.f32.mrf.mxu1 }
 0x217   :  { %v1493_v56 = vpop.f32.mrf.mxu1 }
 0x218   :  { %v527_v59 = vmul.f32 %v1491_v55, %v1493_v56 }
 0x219   :  { %v1497_v60 = vpop.f32.mrf.mxu1 }
 0x21a   :  { %v1500_v30 = vadd.f32 %v527_v59, %v1790_v14  ;;  %v528_v13 = vmul.f32 %v1491_v55, %v1497_v60 }
 0x21b   :  { %v1504_v29 = vpop.f32.mrf.mxu1 }
 0x21c   :  { %1791 = vst [vmem:[#allocation40_spill] sm:$0xff] %v1500_v30  ;;  %v1507_v28 = vadd.f32 %v528_v13, %v1792_v12  ;;  %v529_v57 = vmul.f32 %v1491_v55, %v1504_v29  ;;  %v1802_v13 = vld [vmem:[#allocation21_spill] sm:$0xff] }
 0x21d   :  { %v1511_v23 = vpop.f32.mrf.mxu1 }
 0x21e   :  { %1793 = vst [vmem:[#allocation42_spill] sm:$0xff] %v1507_v28  ;;  %v1518_v4 = vadd.f32 %v529_v57, %v1403_v31  ;;  %v530_v20 = vmul.f32 %v1491_v55, %v1511_v23 }
 0x21f   :  { %v1522_v58 = vpop.f32.mrf.mxu1 }
 0x220   :  { %1796 = vst [vmem:[#allocation15_spill] sm:$0xff] %v1518_v4  ;;  %v1525_v9 = vadd.f32 %v530_v20, %v1409_v2  ;;  %v531_v7 = vmul.f32 %v1491_v55, %v1522_v58 }
 0x221   :  { %v1529_v25 = vpop.f32.mrf.mxu1 }
 0x222   :  { %1797 = vst [vmem:[#allocation18_spill] sm:$0xff] %v1525_v9  ;;  %v1532_v19 = vadd.f32 %v531_v7, %v1417_v15  ;;  %v532_v31 = vmul.f32 %v1491_v55, %v1529_v25  ;;  %v1806_v7 = vld [vmem:[#allocation25_spill] sm:$0xff] }
 0x223   :  { %v1536_v21 = vpop.f32.mrf.mxu1 }
 0x224   :  { %1798 = vst [vmem:[#allocation43_spill] sm:$0xff] %v1532_v19  ;;  %v1538_v6 = vadd.f32 %v532_v31, %v337_v3  ;;  %v533_v10 = vmul.f32 %v1491_v55, %v1536_v21 }
 0x225   :  { %v470_v2 = vpop.f32.mrf.mxu1 }
 0x226   :  { %1799 = vst [vmem:[#allocation44_spill] sm:$0xff] %v1538_v6  ;;  %v1543_v24 = vadd.f32 %v533_v10, %v1800_v18  ;;  %v534_v59 = vmul.f32 %v1491_v55, %v470_v2  ;;  %v1808_v18 = vld [vmem:[#allocation27_spill] sm:$0xff] }
 0x227   :  { %v474_v14 = vpop.f32.mrf.mxu1 }
 0x228   :  { %1801 = vst [vmem:[#allocation19_spill] sm:$0xff] %v1543_v24  ;;  %v1547_v15 = vadd.f32 %v534_v59, %v1802_v13  ;;  %v535_v12 = vmul.f32 %v1491_v55, %v474_v14 }
 0x229   :  { %v476_v57 = vpop.f32.mrf.mxu1 }
 0x22a   :  { %1803 = vst [vmem:[#allocation21_spill] sm:$0xff] %v1547_v15  ;;  %v1551_v5 = vadd.f32 %v535_v12, %v1804_v22  ;;  %v536_v26 = vmul.f32 %v1491_v55, %v476_v57  ;;  %v1810_v15 = vld [vmem:[#allocation29_spill] sm:$0xff] }
 0x22b   :  { %v480_v20 = vpop.f32.mrf.mxu1 }
 0x22c   :  { %1805 = vst [vmem:[#allocation23_spill] sm:$0xff] %v1551_v5  ;;  %v1555_v3 = vadd.f32 %v536_v26, %v1806_v7  ;;  %v537_v31 = vmul.f32 %v1491_v55, %v480_v20  ;;  %v1812_v5 = vld [vmem:[#allocation31_spill] sm:$0xff] }
 0x22d   :  { %v482_v10 = vpop.f32.mrf.mxu1 }
 0x22e   :  { %1807 = vst [vmem:[#allocation25_spill] sm:$0xff] %v1555_v3  ;;  %v1559_v24 = vadd.f32 %v537_v31, %v1808_v18  ;;  %v538_v59 = vmul.f32 %v1491_v55, %v482_v10  ;;  %v1814_v3 = vld [vmem:[#allocation33_spill] sm:$0xff] }
 0x22f   :  { %v486_v13 = vpop.f32.mrf.mxu1 }
 0x230   :  { %1809 = vst [vmem:[#allocation27_spill] sm:$0xff] %v1559_v24  ;;  %v1563_v6 = vadd.f32 %v538_v59, %v1810_v15  ;;  %v539_v12 = vmul.f32 %v1491_v55, %v486_v13  ;;  %v1816_v24 = vld [vmem:[#allocation35_spill] sm:$0xff] }
 0x231   :  { %v488_v22 = vpop.f32.mrf.mxu1 }
 0x232   :  { %1811 = vst [vmem:[#allocation29_spill] sm:$0xff] %v1563_v6  ;;  %v1567_v19 = vadd.f32 %v539_v12, %v1812_v5  ;;  %v540_v26 = vmul.f32 %v1491_v55, %v488_v22  ;;  %v1818_v6 = vld [vmem:[#allocation37_spill] sm:$0xff] }
 0x233   :  { %v492_v7 = vpop.f32.mrf.mxu1 }
 0x234   :  { %1813 = vst [vmem:[#allocation31_spill] sm:$0xff] %v1567_v19  ;;  %v1571_v9 = vadd.f32 %v540_v26, %v1814_v3  ;;  %v541_v31 = vmul.f32 %v1491_v55, %v492_v7  ;;  %v1820_v19 = vld [vmem:[#allocation39_spill] sm:$0xff] }
 0x235   :  { %v494_v18 = vpop.f32.mrf.mxu1 }
 0x236   :  { %1815 = vst [vmem:[#allocation33_spill] sm:$0xff] %v1571_v9  ;;  %v1575_v4 = vadd.f32 %v541_v31, %v1816_v24  ;;  %v542_v15 = vmul.f32 %v1491_v55, %v494_v18  ;;  %v1822_v9 = vld [vmem:[#allocation41_spill] sm:$0xff] }
 0x237   :  { %v498_v59 = vpop.f32.mrf.mxu1 }
 0x238   :  { %1817 = vst [vmem:[#allocation35_spill] sm:$0xff] %v1575_v4  ;;  %v1579_v28 = vadd.f32 %v542_v15, %v1818_v6  ;;  %v543_v5 = vmul.f32 %v1491_v55, %v498_v59  ;;  %v1824_v4 = vld [vmem:[#allocation14_spill] sm:$0xff]  ;;  %v321_v6 = vmul.f32 %v1211_v50, %v1412_v49 }
 0x239   :  { %v500_v12 = vpop.f32.mrf.mxu1  ;;  %v126_v45 = vmul.f32 %v1795_v11, %v1824_v4  ;;  %v1831_v4 = vld [vmem:[#allocation28_spill] sm:$0xff] }
 0x23a   :  { %1819 = vst [vmem:[#allocation37_spill] sm:$0xff] %v1579_v28  ;;  %v1583_v30 = vadd.f32 %v543_v5, %v1820_v19  ;;  %v544_v3 = vmul.f32 %v1491_v55, %v500_v12 }
 0x23b   :  { %v504_v26 = vpop.f32.mrf.mxu1 }
 0x23c   :  { %1821 = vst [vmem:[#allocation39_spill] sm:$0xff] %v1583_v30  ;;  %v1587_v47 = vadd.f32 %v544_v3, %v1822_v9  ;;  %v545_v24 = vmul.f32 %v1491_v55, %v504_v26 }
 0x23d   :  { %v506_v31 = vpop.f32.mrf.mxu1 }
 0x23e   :  { %1823 = vst [vmem:[#allocation41_spill] sm:$0xff] %v1587_v47  ;;  %v1595_v15 = vadd.f32 %v545_v24, %v1400_v8  ;;  %v546_v19 = vmul.f32 %v1491_v55, %v506_v31  ;;  %v353_v47 = vadd.f32 %v321_v6, %v126_v45 }
 0x23f   :  { %v510_v5 = vpop.f32.mrf.mxu1 }
 0x240   :  { %v1599_v30 = vadd.f32 %v546_v19, %v1406_v63  ;;  %v547_v9 = vmul.f32 %v1491_v55, %v510_v5  ;;  %v1829_v63 = vld [vmem:[#allocation24_spill] sm:$0xff] }
 0x241   :  { %v512_v3 = vpop.f32.mrf.mxu1 }
 0x242   :  { %v1603_v28 = vadd.f32 %v547_v9, %v1414_v27  ;;  %v548_v11 = vmul.f32 %v1491_v55, %v512_v3  ;;  %581 = vmatprep.subr.mxu0 %v512_v3  ;;  %v521_v27 = vmul.f32 %v1491_v55, %v1479_v61 }
 0x243   :  { %582 = vmatpush1.msra.mxu0 %v510_v5  ;;  %v1835_v5 = vld [vmem:[#allocation36_spill] sm:$0xff] }
 0x244   :  { %v1606_v49 = vadd.f32 %v548_v11, %v353_v47  ;;  %583 = vmatprep.subr.mxu0 %v506_v31 }
 0x245   :  { %584 = vmatpush1.msra.mxu0 %v504_v26  ;;  %v1834_v26 = vld [vmem:[#allocation34_spill] sm:$0xff] }
 0x246   :  { %585 = vmatprep.subr.mxu0 %v500_v12 }
 0x247   :  { %586 = vmatpush1.msra.mxu0 %v498_v59 }
 0x248   :  { %587 = vmatprep.subr.mxu0 %v494_v18 }
 0x249   :  { %588 = vmatpush1.msra.mxu0 %v492_v7 }
 0x24a   :  { %589 = vmatprep.subr.mxu0 %v488_v22  ;;  %v1833_v22 = vld [vmem:[#allocation32_spill] sm:$0xff] }
 0x24b   :  { %590 = vmatpush1.msra.mxu0 %v486_v13 }
 0x24c   :  { %591 = vmatprep.subr.mxu0 %v482_v10 }
 0x24d   :  { %592 = vmatpush1.msra.mxu0 %v480_v20 }
 0x24e   :  { %593 = vmatprep.subr.mxu0 %v476_v57 }
 0x24f   :  { %594 = vmatpush1.msra.mxu0 %v474_v14  ;;  %v1832_v14 = vld [vmem:[#allocation30_spill] sm:$0xff] }
 0x250   :  { %595 = vmatprep.subr.mxu0 %v470_v2 }
 0x251   :  { %596 = vmatpush1.msra.mxu0 %v1536_v21 }
 0x252   :  { %597 = vmatprep.subr.mxu0 %v1529_v25 }
 0x253   :  { %598 = vmatpush1.msra.mxu0 %v1522_v58  ;;  %v553_v58 = vadd.f32 %v521_v27, %v1831_v4  ;;  %v1840_v27 = vld [vmem:[#allocation18_spill] sm:$0xff] }
 0x254   :  { %599 = vmatprep.subr.mxu0 %v1511_v23 }
 0x255   :  { %600 = vmatpush1.msra.mxu0 %v1504_v29 }
 0x256   :  { %601 = vmatprep.subr.mxu0 %v1497_v60  ;;  %v522_v60 = vmul.f32 %v1491_v55, %v1481_v62 }
 0x257   :  { %602 = vmatpush1.msra.mxu0 %v1493_v56 }
 0x258   :  { %603 = vmatprep.subr.mxu0 %v1489_v52  ;;  %v554_v57 = vadd.f32 %v522_v60, %v1832_v14  ;;  %v1844_v14 = vld [vmem:[#allocation21_spill] sm:$0xff] }
 0x259   :  { %604 = vmatpush1.msra.mxu0 %v1487_v51 }
 0x25a   :  { %605 = vmatprep.subr.mxu0 %v1485_v32 }
 0x25b   :  { %606 = vmatpush1.msra.mxu0 %v1483_v16 }
 0x25c   :  { %607 = vmatprep.subr.mxu0 %v1481_v62  ;;  %v524_v62 = vmul.f32 %v1491_v55, %v1485_v32  ;;  %v526_v32 = vmul.f32 %v1491_v55, %v1489_v52 }
 0x25d   :  { %608 = vmatpush1.msra.mxu0 %v1479_v61  ;;  %v523_v61 = vmul.f32 %v1491_v55, %v1483_v16  ;;  %v525_v16 = vmul.f32 %v1491_v55, %v1487_v51 }
 0x25e   :  { %609 = vmatprep.subr.mxu0 %v1477_v54  ;;  %v556_v24 = vadd.f32 %v524_v62, %v1834_v26  ;;  %v1847_v26 = vld [vmem:[#allocation27_spill] sm:$0xff] }
 0x25f   :  { %610 = vmatpush1.msra.mxu0 %v1475_v53  ;;  %v555_v7 = vadd.f32 %v523_v61, %v1833_v22  ;;  %v557_v9 = vadd.f32 %v525_v16, %v1835_v5  ;;  %v1843_v61 = vld [vmem:[#allocation19_spill] sm:$0xff]  ;;  %v1846_v16 = vld [vmem:[#allocation25_spill] sm:$0xff] }
 0x260   :  { %611 = vmatprep.subr.mxu0 %v1473_v1 }
 0x261   :  { %612 = vmatpush1.msra.mxu0 %v1471_v0 }
 0x262   :  { %646 = vmatmul.mubr.f32.vlgmr.msra.gmra.mxu0 %v1145_v34  ;;  %v1826_v34 = vld [vmem:[#allocation17_spill] sm:$0xff] }
 0x263   :  { %651 = vmatprep.mubr.f32.mxu0 %v1789_v17 }
 0x266   :  { %652 = vmatmul.mubr.f32.gmra.mxu0 %v1155_v36  ;;  %v1658_v36 = vstv %s860_s29 }
 0x267   :  { %657 = vmatprep.mubr.f32.mxu0 %v1789_v17 }
 0x26a   :  { %658 = vmatmul.mubr.f32.gmra.mxu0 %v1163_v38 }
 0x26b   :  { %663 = vmatprep.mubr.f32.mxu0 %v1789_v17 }
 0x26e   :  { %664 = vmatmul.mubr.f32.gmra.mxu0 %v1171_v40 }
 0x26f   :  { %669 = vmatprep.mubr.f32.mxu0 %v1789_v17 }
 0x272   :  { %670 = vmatmul.mubr.f32.gmra.mxu0 %v1179_v42 }
 0x273   :  { %675 = vmatprep.mubr.f32.mxu0 %v1789_v17 }
 0x276   :  { %676 = vmatmul.mubr.f32.gmra.mxu0 %v1187_v44  ;;  %v1828_v44 = vld [vmem:[#allocation22_spill] sm:$0xff] }
 0x277   :  { %681 = vmatprep.mubr.f32.mxu0 %v1789_v17 }
 0x27a   :  { %682 = vmatmul.mubr.f32.gmra.mxu0 %v1195_v46  ;;  %v520_v46 = vmul.f32 %v1491_v55, %v1477_v54 }
 0x27b   :  { %687 = vmatprep.mubr.f32.mxu0 %v1789_v17 }
 0x27e   :  { %688 = vmatmul.mubr.f32.gmra.mxu0 %v1203_v48 }
 0x27f   :  { %693 = vmatprep.mubr.f32.mxu0 %v1789_v17 }
 0x282   :  { %694 = vmatmul.mubr.f32.gmra.mxu0 %v1142_v33  ;;  %v1825_v33 = vld [vmem:[#allocation16_spill] sm:$0xff] }
 0x283   :  { %699 = vmatprep.mubr.f32.mxu0 %v1789_v17 }
 0x286   :  { %700 = vmatmul.mubr.f32.gmra.mxu0 %v1152_v35  ;;  %v517_v35 = vmul.f32 %v1491_v55, %v1471_v0 }
 0x287   :  { %705 = vmatprep.mubr.f32.mxu0 %v1789_v17 }
 0x28a   :  { %706 = vmatmul.mubr.f32.gmra.mxu0 %v1160_v37  ;;  %v518_v37 = vmul.f32 %v1491_v55, %v1473_v1 }
 0x28b   :  { %711 = vmatprep.mubr.f32.mxu0 %v1789_v17 }
 0x28c   :  { %v550_v45 = vadd.f32 %v518_v37, %v1828_v44  ;;  %v1838_v44 = vld [vmem:[#allocation42_spill] sm:$0xff] }
 0x28e   :  { %712 = vmatmul.mubr.f32.gmra.mxu0 %v1168_v39  ;;  %v1827_v39 = vld [vmem:[#allocation20_spill] sm:$0xff] }
 0x28f   :  { %717 = vmatprep.mubr.f32.mxu0 %v1789_v17  ;;  %v549_v40 = vadd.f32 %v517_v35, %v1827_v39 }
 0x292   :  { %718 = vmatmul.mubr.f32.gmra.mxu0 %v1176_v41  ;;  %v519_v41 = vmul.f32 %v1491_v55, %v1475_v53  ;;  %v1830_v53 = vld [vmem:[#allocation26_spill] sm:$0xff] }
 0x293   :  { %723 = vmatprep.mubr.f32.mxu0 %v1789_v17  ;;  %v552_v56 = vadd.f32 %v520_v46, %v1830_v53  ;;  %v1841_v53 = vld [vmem:[#allocation43_spill] sm:$0xff] }
 0x294   :  { %v551_v8 = vadd.f32 %v519_v41, %v1829_v63 }
 0x296   :  { %724 = vmatmul.mubr.f32.gmra.mxu0 %v1184_v43 }
 0x297   :  { %729 = vmatprep.mubr.f32.mxu0 %v1789_v17 }
 0x29a   :  { %730 = vmatmul.mubr.f32.gmra.mxu0 %v1825_v33  ;;  %v1836_v33 = vld [vmem:[#allocation38_spill] sm:$0xff] }
 0x29b   :  { %735 = vmatprep.mubr.f32.mxu0 %v1789_v17 }
 0x29e   :  { %736 = vmatmul.mubr.f32.gmra.mxu0 %v1826_v34  ;;  %v558_v34 = vadd.f32 %v526_v32, %v1836_v33 }
 0x322   :  { %v647_v38 = vpop.f32.mrf.mxu0 }
 0x323   :  { %v744_v42 = vmul.f32 %v1658_v36, %v647_v38 }
 0x324   :  { %v649_v43 = vpop.f32.mrf.mxu0 }
 0x325   :  { %v776_v47 = vadd.f32 %v744_v42, %v549_v40  ;;  %v745_v48 = vmul.f32 %v1658_v36, %v649_v43  ;;  %v1837_v40 = vld [vmem:[#allocation40_spill] sm:$0xff] }
 0x326   :  { %v653_v50 = vpop.f32.mrf.mxu0 }
 0x327   :  { %808 = vst [vmem:[#allocation9] sm:$0xff] %v776_v47  ;;  %v777_v17 = vadd.f32 %v745_v48, %v550_v45  ;;  %v746_v0 = vmul.f32 %v1658_v36, %v653_v50  ;;  %v1839_v48 = vld [vmem:[#allocation15_spill] sm:$0xff] }
 0x328   :  { %v655_v1 = vpop.f32.mrf.mxu0 }
 0x329   :  { %809 = vst [vmem:[#allocation9 + $0x8] sm:$0xff] %v777_v17  ;;  %v778_v54 = vadd.f32 %v746_v0, %v551_v8  ;;  %v747_v29 = vmul.f32 %v1658_v36, %v655_v1 }
 0x32a   :  { %v659_v23 = vpop.f32.mrf.mxu0 }
 0x32b   :  { %810 = vst [vmem:[#allocation9 + $0x10] sm:$0xff] %v778_v54  ;;  %v779_v25 = vadd.f32 %v747_v29, %v552_v56  ;;  %v748_v21 = vmul.f32 %v1658_v36, %v659_v23  ;;  %v1842_v29 = vld [vmem:[#allocation44_spill] sm:$0xff] }
 0x32c   :  { %v661_v2 = vpop.f32.mrf.mxu0 }
 0x32d   :  { %811 = vst [vmem:[#allocation9 + $0x18] sm:$0xff] %v779_v25  ;;  %v780_v20 = vadd.f32 %v748_v21, %v553_v58  ;;  %v749_v10 = vmul.f32 %v1658_v36, %v661_v2 }
 0x32e   :  { %v665_v13 = vpop.f32.mrf.mxu0 }
 0x32f   :  { %812 = vst [vmem:[#allocation9 + $0x20] sm:$0xff] %v780_v20  ;;  %v781_v18 = vadd.f32 %v749_v10, %v554_v57  ;;  %v750_v59 = vmul.f32 %v1658_v36, %v665_v13  ;;  %v1845_v10 = vld [vmem:[#allocation23_spill] sm:$0xff] }
 0x330   :  { %v667_v12 = vpop.f32.mrf.mxu0 }
 0x331   :  { %813 = vst [vmem:[#allocation9 + $0x28] sm:$0xff] %v781_v18  ;;  %v782_v31 = vadd.f32 %v750_v59, %v555_v7  ;;  %v751_v6 = vmul.f32 %v1658_v36, %v667_v12 }
 0x332   :  { %v671_v19 = vpop.f32.mrf.mxu0 }
 0x333   :  { %814 = vst [vmem:[#allocation9 + $0x30] sm:$0xff] %v782_v31  ;;  %v783_v3 = vadd.f32 %v751_v6, %v556_v24  ;;  %v752_v51 = vmul.f32 %v1658_v36, %v671_v19  ;;  %v1848_v6 = vld [vmem:[#allocation29_spill] sm:$0xff] }
 0x334   :  { %v673_v11 = vpop.f32.mrf.mxu0 }
 0x335   :  { %815 = vst [vmem:[#allocation9 + $0x38] sm:$0xff] %v783_v3  ;;  %v784_v35 = vadd.f32 %v752_v51, %v557_v9  ;;  %v753_v37 = vmul.f32 %v1658_v36, %v673_v11  ;;  %v1849_v3 = vld [vmem:[#allocation31_spill] sm:$0xff] }
 0x336   :  { %v677_v38 = vpop.f32.mrf.mxu0 }
 0x337   :  { %816 = vst [vmem:[#allocation9 + $0x40] sm:$0xff] %v784_v35  ;;  %v785_v52 = vadd.f32 %v753_v37, %v558_v34  ;;  %v754_v55 = vmul.f32 %v1658_v36, %v677_v38  ;;  %v1850_v34 = vld [vmem:[#allocation33_spill] sm:$0xff] }
 0x338   :  { %v679_v39 = vpop.f32.mrf.mxu0 }
 0x339   :  { %817 = vst [vmem:[#allocation9 + $0x48] sm:$0xff] %v785_v52  ;;  %v786_v41 = vadd.f32 %v754_v55, %v1837_v40  ;;  %v755_v42 = vmul.f32 %v1658_v36, %v679_v39  ;;  %v1851_v52 = vld [vmem:[#allocation35_spill] sm:$0xff] }
 0x33a   :  { %v683_v43 = vpop.f32.mrf.mxu0 }
 0x33b   :  { %818 = vst [vmem:[#allocation9 + $0x50] sm:$0xff] %v786_v41  ;;  %v787_v45 = vadd.f32 %v755_v42, %v1838_v44  ;;  %v756_v46 = vmul.f32 %v1658_v36, %v683_v43  ;;  %v1852_v41 = vld [vmem:[#allocation37_spill] sm:$0xff] }
 0x33c   :  { %v685_v47 = vpop.f32.mrf.mxu0 }
 0x33d   :  { %819 = vst [vmem:[#allocation9 + $0x58] sm:$0xff] %v787_v45  ;;  %v788_v50 = vadd.f32 %v756_v46, %v1839_v48  ;;  %v757_v63 = vmul.f32 %v1658_v36, %v685_v47  ;;  %v1853_v45 = vld [vmem:[#allocation39_spill] sm:$0xff] }
 0x33e   :  { %v689_v8 = vpop.f32.mrf.mxu0 }
 0x33f   :  { %820 = vst [vmem:[#allocation9 + $0x60] sm:$0xff] %v788_v50  ;;  %v789_v17 = vadd.f32 %v757_v63, %v1840_v27  ;;  %v758_v0 = vmul.f32 %v1658_v36, %v689_v8  ;;  %v1854_v50 = vld [vmem:[#allocation41_spill] sm:$0xff] }
 0x340   :  { %v691_v1 = vpop.f32.mrf.mxu0 }
 0x341   :  { %821 = vst [vmem:[#allocation9 + $0x68] sm:$0xff] %v789_v17  ;;  %v790_v56 = vadd.f32 %v758_v0, %v1841_v53  ;;  %v759_v60 = vmul.f32 %v1658_v36, %v691_v1 }
 0x342   :  { %v695_v54 = vpop.f32.mrf.mxu0 }
 0x343   :  { %822 = vst [vmem:[#allocation9 + $0x70] sm:$0xff] %v790_v56  ;;  %v791_v23 = vadd.f32 %v759_v60, %v1842_v29  ;;  %v760_v4 = vmul.f32 %v1658_v36, %v695_v54 }
 0x344   :  { %v697_v58 = vpop.f32.mrf.mxu0 }
 0x345   :  { %823 = vst [vmem:[#allocation9 + $0x78] sm:$0xff] %v791_v23  ;;  %v792_v25 = vadd.f32 %v760_v4, %v1843_v61  ;;  %v761_v21 = vmul.f32 %v1658_v36, %v697_v58 }
 0x346   :  { %v701_v2 = vpop.f32.mrf.mxu0 }
 0x347   :  { %824 = vst [vmem:[#allocation9 + $0x80] sm:$0xff] %v792_v25  ;;  %v793_v57 = vadd.f32 %v761_v21, %v1844_v14  ;;  %v762_v62 = vmul.f32 %v1658_v36, %v701_v2 }
 0x348   :  { %v703_v20 = vpop.f32.mrf.mxu0 }
 0x349   :  { %825 = vst [vmem:[#allocation9 + $0x88] sm:$0xff] %v793_v57  ;;  %v794_v13 = vadd.f32 %v762_v62, %v1845_v10  ;;  %v763_v22 = vmul.f32 %v1658_v36, %v703_v20 }
 0x34a   :  { %v707_v7 = vpop.f32.mrf.mxu0 }
 0x34b   :  { %826 = vst [vmem:[#allocation9 + $0x90] sm:$0xff] %v794_v13  ;;  %v795_v18 = vadd.f32 %v763_v22, %v1846_v16  ;;  %v764_v59 = vmul.f32 %v1658_v36, %v707_v7 }
 0x34c   :  { %v709_v12 = vpop.f32.mrf.mxu0 }
 0x34d   :  { %827 = vst [vmem:[#allocation9 + $0x98] sm:$0xff] %v795_v18  ;;  %v796_v24 = vadd.f32 %v764_v59, %v1847_v26  ;;  %v765_v32 = vmul.f32 %v1658_v36, %v709_v12 }
 0x34e   :  { %v713_v31 = vpop.f32.mrf.mxu0 }
 0x34f   :  { %828 = vst [vmem:[#allocation9 + $0xa0] sm:$0xff] %v796_v24  ;;  %v797_v19 = vadd.f32 %v765_v32, %v1848_v6  ;;  %v766_v5 = vmul.f32 %v1658_v36, %v713_v31 }
 0x350   :  { %v715_v9 = vpop.f32.mrf.mxu0 }
 0x351   :  { %829 = vst [vmem:[#allocation9 + $0xa8] sm:$0xff] %v797_v19  ;;  %v798_v51 = vadd.f32 %v766_v5, %v1849_v3  ;;  %v767_v11 = vmul.f32 %v1658_v36, %v715_v9 }
 0x352   :  { %v719_v33 = vpop.f32.mrf.mxu0 }
 0x353   :  { %830 = vst [vmem:[#allocation9 + $0xb0] sm:$0xff] %v798_v51  ;;  %v799_v35 = vadd.f32 %v767_v11, %v1850_v34  ;;  %v768_v37 = vmul.f32 %v1658_v36, %v719_v33 }
 0x354   :  { %v721_v38 = vpop.f32.mrf.mxu0 }
 0x355   :  { %831 = vst [vmem:[#allocation9 + $0xb8] sm:$0xff] %v799_v35  ;;  %v800_v55 = vadd.f32 %v768_v37, %v1851_v52  ;;  %v769_v39 = vmul.f32 %v1658_v36, %v721_v38 }
 0x356   :  { %v725_v40 = vpop.f32.mrf.mxu0 }
 0x357   :  { %832 = vst [vmem:[#allocation9 + $0xc0] sm:$0xff] %v800_v55  ;;  %v801_v42 = vadd.f32 %v769_v39, %v1852_v41  ;;  %v770_v43 = vmul.f32 %v1658_v36, %v725_v40 }
 0x358   :  { %v727_v44 = vpop.f32.mrf.mxu0 }
 0x359   :  { %833 = vst [vmem:[#allocation9 + $0xc8] sm:$0xff] %v801_v42  ;;  %v802_v46 = vadd.f32 %v770_v43, %v1853_v45  ;;  %v771_v47 = vmul.f32 %v1658_v36, %v727_v44 }
 0x35a   :  { %v731_v48 = vpop.f32.mrf.mxu0 }
 0x35b   :  { %834 = vst [vmem:[#allocation9 + $0xd0] sm:$0xff] %v802_v46  ;;  %v803_v63 = vadd.f32 %v771_v47, %v1854_v50  ;;  %v772_v8 = vmul.f32 %v1658_v36, %v731_v48 }
 0x35c   :  { %v733_v27 = vpop.f32.mrf.mxu0 }
 0x35d   :  { %835 = vst [vmem:[#allocation9 + $0xd8] sm:$0xff] %v803_v63  ;;  %v804_v17 = vadd.f32 %v772_v8, %v1595_v15  ;;  %v773_v0 = vmul.f32 %v1658_v36, %v733_v27 }
 0x35e   :  { %v737_v1 = vpop.f32.mrf.mxu0 }
 0x35f   :  { %836 = vst [vmem:[#allocation9 + $0xe0] sm:$0xff] %v804_v17  ;;  %v805_v53 = vadd.f32 %v773_v0, %v1599_v30  ;;  %v774_v56 = vmul.f32 %v1658_v36, %v737_v1 }
 0x360   :  { %v739_v60 = vpop.f32.mrf.mxu0 }
 0x361   :  { %837 = vst [vmem:[#allocation9 + $0xe8] sm:$0xff] %v805_v53  ;;  %v806_v54 = vadd.f32 %v774_v56, %v1603_v28  ;;  %v775_v29 = vmul.f32 %v1658_v36, %v739_v60 }
 0x363   :  { %838 = vst [vmem:[#allocation9 + $0xf0] sm:$0xff] %v806_v54  ;;  %v807_v23 = vadd.f32 %v775_v29, %v1606_v49 }
 0x365   :  { %839 = vst [vmem:[#allocation9 + $0xf8] sm:$0xff] %v807_v23 }
 0x366   :  { %961 = shalt.err (!%p958_p0)
}
 0x367   :  { %851 = dma.vmem_to_hbm [thread:$0]  %s846_s4, 4096, %s1751_s3, [#allocation6], %s983_s24, %s983_s24, %s984_s25  }
 0x368   :  { %976 = dma.done.wait [#allocation6], 4096  }
 0x369   :  { %977 = vsyncadd [#allocation6], 4294963200 }
 0x36a   :  { %855 = vsyncpa [#allocation5], 1 }
 0x36b   :  { %856 = vsyncpa [#allocation8], 1 }
 0x36c   :  { %857 = vsyncpa [#allocation6], 1 }

</bundles_post_ra>
